<compile_context>
chip_gen: v7x
topology: tpu7x:2x2x1
jax: 0.10.0
libtpu: 0.0.40
codegen_flags: <defaults>
</compile_context>

<pallas_src>
import jax
import jax.numpy as jnp
from jax import lax
from jax.experimental import pallas as pl
from jax.experimental.pallas import tpu as pltpu


def bigru_kernel(xaug_ref, wih_ref, bih_ref, whh_ref, bhhn_ref, wemb_ref, bemb_ref,
                 out_ref, hidden_ref, rec_ref):
    _, B, H = hidden_ref.shape
    TB = out_ref.shape[0]
    T = TB // B

    # ---- hoisted input projection: one MXU matmul, both directions, all gates ----
    # Column order (gate-major): [r_f r_b | z_f z_b | n_f n_b].
    # Backward half of x_aug is pre-time-reversed, so row block i == loop step i
    # for BOTH directions.  r/z hidden biases are already folded into bih.
    gi_all = (jnp.dot(xaug_ref[...], wih_ref[...],
                      preferred_element_type=jnp.float32)
              + bih_ref[...])                                   # (T*B, 6H), in vregs

    # ---- hoisted loop invariants ----
    whh = whh_ref[...]                                          # (2H, 6H) block-diag
    bhh_n = jnp.broadcast_to(bhhn_ref[...], (B, 2 * H))         # hoisted broadcast

    h = jnp.zeros((B, 2 * H), jnp.float32)                      # carry [h_f | h_b]

    # ---- fused fwd+bwd recurrence, fully unrolled (T small & static) ----
    # One hidden matmul per step; gate math once on (B, 2H)-wide slabs.
    for i in range(T):
        gi = gi_all[i * B:(i + 1) * B, :]                            # (B, 6H), static
        gh = jnp.dot(h, whh, preferred_element_type=jnp.float32)     # (B, 6H)
        r = jax.nn.sigmoid(gi[:, 0:2 * H] + gh[:, 0:2 * H])
        z = jax.nn.sigmoid(gi[:, 2 * H:4 * H] + gh[:, 2 * H:4 * H])
        n = jnp.tanh(gi[:, 4 * H:6 * H] + r * (gh[:, 4 * H:6 * H] + bhh_n))
        h = (1.0 - z) * n + z * h
        # fwd output belongs to time i, bwd output to time T-1-i (static slices).
        rec_ref[i * B:(i + 1) * B, 0:H] = h[:, 0:H]
        rec_ref[(T - 1 - i) * B:(T - i) * B, H:2 * H] = h[:, H:2 * H]

    hidden_ref[0] = h[:, 0:H]           # forward final hidden (after t = T-1)
    hidden_ref[1] = h[:, H:2 * H]       # backward final hidden (after t = 0)

    # ---- embedding epilogue: single (T*B, 2H) x (2H, O) matmul + bias ----
    out_ref[...] = (jnp.dot(rec_ref[...], wemb_ref[...],
                            preferred_element_type=jnp.float32)
                    + bemb_ref[...])


def bidirectional_gru(x, params):
    T, B, I = x.shape
    H = params['whh_f'].shape[1]      # whh_f: (3H, H)
    O = params['wemb'].shape[0]       # wemb:  (O, 2H)

    # ---- plain-JAX parameter prep (one-time glue outside the kernel) ----
    wih_f_T = params['wih_f'].T       # (I, 3H), cols [r | z | n]
    wih_b_T = params['wih_b'].T
    whh_f_T = params['whh_f'].T       # (H, 3H)
    whh_b_T = params['whh_b'].T
    Zi = jnp.zeros((I, H), jnp.float32)
    Zh = jnp.zeros((H, H), jnp.float32)

    # Gate-major, direction-interleaved column order: [r_f r_b | z_f z_b | n_f n_b].
    wih_blk = jnp.concatenate([
        jnp.concatenate([wih_f_T[:, 0:H], Zi,
                         wih_f_T[:, H:2 * H], Zi,
                         wih_f_T[:, 2 * H:3 * H], Zi], axis=1),
        jnp.concatenate([Zi, wih_b_T[:, 0:H],
                         Zi, wih_b_T[:, H:2 * H],
                         Zi, wih_b_T[:, 2 * H:3 * H]], axis=1),
    ], axis=0)                                                   # (2I, 6H)
    whh_blk = jnp.concatenate([
        jnp.concatenate([whh_f_T[:, 0:H], Zh,
                         whh_f_T[:, H:2 * H], Zh,
                         whh_f_T[:, 2 * H:3 * H], Zh], axis=1),
        jnp.concatenate([Zh, whh_b_T[:, 0:H],
                         Zh, whh_b_T[:, H:2 * H],
                         Zh, whh_b_T[:, 2 * H:3 * H]], axis=1),
    ], axis=0)                                                   # (2H, 6H)

    bih_f, bih_b = params['bih_f'], params['bih_b']
    bhh_f, bhh_b = params['bhh_f'], params['bhh_b']
    # r/z thirds of bhh fold into the projection bias; bhh_n stays in-step (r * (...)).
    bih_cat = jnp.concatenate([
        bih_f[0:H] + bhh_f[0:H],             bih_b[0:H] + bhh_b[0:H],
        bih_f[H:2 * H] + bhh_f[H:2 * H],     bih_b[H:2 * H] + bhh_b[H:2 * H],
        bih_f[2 * H:3 * H],                  bih_b[2 * H:3 * H],
    ]).reshape(1, 6 * H)
    bhh_n_cat = jnp.concatenate([bhh_f[2 * H:3 * H],
                                 bhh_b[2 * H:3 * H]]).reshape(1, 2 * H)

    # x augmented with its time-reverse: ONE matmul then yields both directions'
    # projections with the backward half already time-aligned to the loop index.
    x_flat = x.reshape(T * B, I)
    xrev_flat = jnp.flip(x, axis=0).reshape(T * B, I)
    x_aug = jnp.concatenate([x_flat, xrev_flat], axis=-1)        # (T*B, 2I)

    args = (x_aug, wih_blk, bih_cat, whh_blk, bhh_n_cat,
            params['wemb'].T, params['bemb'].reshape(1, O))

    vmem = pl.BlockSpec(memory_space=pltpu.MemorySpace.VMEM)
    out_shape = (jax.ShapeDtypeStruct((T * B, O), jnp.float32),
                 jax.ShapeDtypeStruct((2, B, H), jnp.float32))

    out2d, hidden = pl.pallas_call(
        bigru_kernel,
        out_shape=out_shape,
        in_specs=[vmem] * len(args),
        out_specs=(vmem, vmem),
        scratch_shapes=[pltpu.VMEM((T * B, 2 * H), jnp.float32)],  # per-step [fwd|bwd]
    )(*args)

    # Un-flatten outside the kernel (free XLA metadata).
    return out2d.reshape(T, B, O), hidden


# ---- pure-JAX reference (same math as torch.nn.GRU + nn.Linear) ----
def reference(x, params):
    T, B, _ = x.shape
    H = params['whh_f'].shape[1]

    def cell(x_t, h, wih, whh, bih, bhh):
        gi = x_t @ wih.T + bih
        gh = h @ whh.T + bhh
        i_r, i_z, i_n = jnp.split(gi, 3, axis=-1)
        h_r, h_z, h_n = jnp.split(gh, 3, axis=-1)
        r = jax.nn.sigmoid(i_r + h_r)
        z = jax.nn.sigmoid(i_z + h_z)
        n = jnp.tanh(i_n + r * h_n)
        return (1.0 - z) * n + z * h

    def run(xs, wih, whh, bih, bhh):
        def step(h, x_t):
            h_new = cell(x_t, h, wih, whh, bih, bhh)
            return h_new, h_new
        h_last, ys = lax.scan(step, jnp.zeros((B, H), jnp.float32), xs)
        return ys, h_last

    ys_f, h_f = run(x, params['wih_f'], params['whh_f'],
                    params['bih_f'], params['bhh_f'])
    ys_b_rev, h_b = run(x[::-1], params['wih_b'], params['whh_b'],
                        params['bih_b'], params['bhh_b'])
    ys_b = ys_b_rev[::-1]
    rec = jnp.concatenate([ys_f, ys_b], axis=-1)
    out = rec.reshape(T * B, 2 * H) @ params['wemb'].T + params['bemb']
    return out.reshape(T, B, -1), jnp.stack([h_f, h_b])


if __name__ == "__main__":
    T, B, I, H, O = 8, 2, 32, 32, 16   # seq=8, batch=2, input=32, hidden=32, out=16
    key = jax.random.PRNGKey(0)
    ks = jax.random.split(key, 11)

    def u(k, shape, bound):
        return jax.random.uniform(k, shape, jnp.float32, -bound, bound)

    kg = 1.0 / float(H) ** 0.5          # PyTorch GRU init bound
    ke = 1.0 / float(2 * H) ** 0.5      # PyTorch Linear init bound
    params = {
        'wih_f': u(ks[0], (3 * H, I), kg),
        'whh_f': u(ks[1], (3 * H, H), kg),
        'bih_f': u(ks[2], (3 * H,), kg),
        'bhh_f': u(ks[3], (3 * H,), kg),
        'wih_b': u(ks[4], (3 * H, I), kg),
        'whh_b': u(ks[5], (3 * H, H), kg),
        'bih_b': u(ks[6], (3 * H,), kg),
        'bhh_b': u(ks[7], (3 * H,), kg),
        'wemb':  u(ks[8], (O, 2 * H), ke),
        'bemb':  u(ks[9], (O,), ke),
    }
    x = jax.random.normal(ks[10], (T, B, I), jnp.float32)

    out, hidden = jax.block_until_ready(bidirectional_gru(x, params))
    ref_out, ref_hidden = reference(x, params)

    assert out.shape == (T, B, O) and hidden.shape == (2, B, H)
    assert jnp.allclose(out, ref_out, atol=1e-4, rtol=1e-4)
    assert jnp.allclose(hidden, ref_hidden, atol=1e-4, rtol=1e-4)
    print("KERNEL_OK")
</pallas_src>

<mosaic_0001>
module attributes {stable_mosaic.version = 11 : i64} {
  func.func @bigru_kernel(%arg0: memref<16x64xf32, #tpu.memory_space<vmem>>, %arg1: memref<64x192xf32, #tpu.memory_space<vmem>>, %arg2: memref<1x192xf32, #tpu.memory_space<vmem>>, %arg3: memref<64x192xf32, #tpu.memory_space<vmem>>, %arg4: memref<1x64xf32, #tpu.memory_space<vmem>>, %arg5: memref<64x16xf32, #tpu.memory_space<vmem>>, %arg6: memref<1x16xf32, #tpu.memory_space<vmem>>, %arg7: memref<16x16xf32, #tpu.memory_space<vmem>>, %arg8: memref<2x2x32xf32, #tpu.memory_space<vmem>>, %arg9: memref<16x64xf32, #tpu.memory_space<vmem>>) attributes {dimension_semantics = [], scalar_prefetch = 0 : i64, scratch_operands = 1 : i64, tpu.core_type = #tpu.core_type<tc>} {
    %c0 = arith.constant 0 : index
    %c0_0 = arith.constant 0 : index
    %0 = vector.load %arg0[%c0, %c0_0] : memref<16x64xf32, #tpu.memory_space<vmem>>, vector<16x64xf32>
    %c0_1 = arith.constant 0 : index
    %c0_2 = arith.constant 0 : index
    %1 = vector.load %arg1[%c0_1, %c0_2] : memref<64x192xf32, #tpu.memory_space<vmem>>, vector<64x192xf32>
    %cst = arith.constant dense<0.000000e+00> : vector<16x192xf32>
    %2 = tpu.matmul %0, %1, %cst {dimension_numbers = #tpu.dot_dimension_numbers<[1], [0], [0], [1], [0, 0, 1, 1], [], []>} : vector<16x64xf32>, vector<64x192xf32>, vector<16x192xf32> -> vector<16x192xf32>
    %c0_3 = arith.constant 0 : index
    %c0_4 = arith.constant 0 : index
    %3 = vector.load %arg2[%c0_3, %c0_4] : memref<1x192xf32, #tpu.memory_space<vmem>>, vector<1x192xf32>
    %4 = vector.broadcast %3 : vector<1x192xf32> to vector<16x192xf32>
    %5 = arith.addf %2, %4 : vector<16x192xf32>
    %c0_5 = arith.constant 0 : index
    %c0_6 = arith.constant 0 : index
    %6 = vector.load %arg3[%c0_5, %c0_6] : memref<64x192xf32, #tpu.memory_space<vmem>>, vector<64x192xf32>
    %c0_7 = arith.constant 0 : index
    %c0_8 = arith.constant 0 : index
    %7 = vector.load %arg4[%c0_7, %c0_8] : memref<1x64xf32, #tpu.memory_space<vmem>>, vector<1x64xf32>
    %8 = vector.shape_cast %7 : vector<1x64xf32> to vector<1x64xf32>
    %9 = vector.broadcast %8 : vector<1x64xf32> to vector<2x64xf32>
    %cst_9 = arith.constant 0.000000e+00 : f32
    %10 = vector.broadcast %cst_9 : f32 to vector<2x64xf32>
    %11 = vector.extract_strided_slice %5 {offsets = [0, 0], sizes = [2, 192], strides = [1, 1]} : vector<16x192xf32> to vector<2x192xf32>
    %cst_10 = arith.constant dense<0.000000e+00> : vector<2x192xf32>
    %12 = tpu.matmul %10, %6, %cst_10 {dimension_numbers = #tpu.dot_dimension_numbers<[1], [0], [0], [1], [0, 0, 1, 1], [], []>} : vector<2x64xf32>, vector<64x192xf32>, vector<2x192xf32> -> vector<2x192xf32>
    %13 = vector.extract_strided_slice %11 {offsets = [0, 0], sizes = [2, 64], strides = [1, 1]} : vector<2x192xf32> to vector<2x64xf32>
    %14 = vector.extract_strided_slice %12 {offsets = [0, 0], sizes = [2, 64], strides = [1, 1]} : vector<2x192xf32> to vector<2x64xf32>
    %15 = arith.addf %13, %14 : vector<2x64xf32>
    %16 = arith.negf %15 : vector<2x64xf32>
    %17 = math.exp %16 : vector<2x64xf32>
    %cst_11 = arith.constant 1.000000e+00 : f32
    %18 = vector.broadcast %cst_11 : f32 to vector<2x64xf32>
    %19 = arith.addf %18, %17 : vector<2x64xf32>
    %20 = arith.divf %18, %19 : vector<2x64xf32>
    %21 = vector.extract_strided_slice %11 {offsets = [0, 64], sizes = [2, 64], strides = [1, 1]} : vector<2x192xf32> to vector<2x64xf32>
    %22 = vector.extract_strided_slice %12 {offsets = [0, 64], sizes = [2, 64], strides = [1, 1]} : vector<2x192xf32> to vector<2x64xf32>
    %23 = arith.addf %21, %22 : vector<2x64xf32>
    %24 = arith.negf %23 : vector<2x64xf32>
    %25 = math.exp %24 : vector<2x64xf32>
    %cst_12 = arith.constant 1.000000e+00 : f32
    %26 = vector.broadcast %cst_12 : f32 to vector<2x64xf32>
    %27 = arith.addf %26, %25 : vector<2x64xf32>
    %28 = arith.divf %26, %27 : vector<2x64xf32>
    %29 = vector.extract_strided_slice %11 {offsets = [0, 128], sizes = [2, 64], strides = [1, 1]} : vector<2x192xf32> to vector<2x64xf32>
    %30 = vector.extract_strided_slice %12 {offsets = [0, 128], sizes = [2, 64], strides = [1, 1]} : vector<2x192xf32> to vector<2x64xf32>
    %31 = arith.addf %30, %9 : vector<2x64xf32>
    %32 = arith.mulf %20, %31 : vector<2x64xf32>
    %33 = arith.addf %29, %32 : vector<2x64xf32>
    %34 = math.tanh %33 : vector<2x64xf32>
    %cst_13 = arith.constant 1.000000e+00 : f32
    %35 = vector.broadcast %cst_13 : f32 to vector<2x64xf32>
    %36 = arith.subf %35, %28 : vector<2x64xf32>
    %37 = arith.mulf %36, %34 : vector<2x64xf32>
    %38 = arith.mulf %28, %10 : vector<2x64xf32>
    %39 = arith.addf %37, %38 : vector<2x64xf32>
    %40 = vector.extract_strided_slice %39 {offsets = [0, 0], sizes = [2, 32], strides = [1, 1]} : vector<2x64xf32> to vector<2x32xf32>
    %c0_14 = arith.constant 0 : index
    %c0_15 = arith.constant 0 : index
    %41 = vector.load %arg9[%c0_14, %c0_15] : memref<16x64xf32, #tpu.memory_space<vmem>>, vector<2x32xf32>
    tpu.vector_store %arg9[%c0_14, %c0_15], %40 {strides = array<i32>} : memref<16x64xf32, #tpu.memory_space<vmem>>, vector<2x32xf32>,
    %42 = vector.extract_strided_slice %39 {offsets = [0, 32], sizes = [2, 32], strides = [1, 1]} : vector<2x64xf32> to vector<2x32xf32>
    %c14 = arith.constant 14 : index
    %c32 = arith.constant 32 : index
    %43 = vector.load %arg9[%c14, %c32] : memref<16x64xf32, #tpu.memory_space<vmem>>, vector<2x32xf32>
    tpu.vector_store %arg9[%c14, %c32], %42 {strides = array<i32>} : memref<16x64xf32, #tpu.memory_space<vmem>>, vector<2x32xf32>,
    %44 = vector.extract_strided_slice %5 {offsets = [2, 0], sizes = [2, 192], strides = [1, 1]} : vector<16x192xf32> to vector<2x192xf32>
    %cst_16 = arith.constant dense<0.000000e+00> : vector<2x192xf32>
    %45 = tpu.matmul %39, %6, %cst_16 {dimension_numbers = #tpu.dot_dimension_numbers<[1], [0], [0], [1], [0, 0, 1, 1], [], []>} : vector<2x64xf32>, vector<64x192xf32>, vector<2x192xf32> -> vector<2x192xf32>
    %46 = vector.extract_strided_slice %44 {offsets = [0, 0], sizes = [2, 64], strides = [1, 1]} : vector<2x192xf32> to vector<2x64xf32>
    %47 = vector.extract_strided_slice %45 {offsets = [0, 0], sizes = [2, 64], strides = [1, 1]} : vector<2x192xf32> to vector<2x64xf32>
    %48 = arith.addf %46, %47 : vector<2x64xf32>
    %49 = arith.negf %48 : vector<2x64xf32>
    %50 = math.exp %49 : vector<2x64xf32>
    %cst_17 = arith.constant 1.000000e+00 : f32
    %51 = vector.broadcast %cst_17 : f32 to vector<2x64xf32>
    %52 = arith.addf %51, %50 : vector<2x64xf32>
    %53 = arith.divf %51, %52 : vector<2x64xf32>
    %54 = vector.extract_strided_slice %44 {offsets = [0, 64], sizes = [2, 64], strides = [1, 1]} : vector<2x192xf32> to vector<2x64xf32>
    %55 = vector.extract_strided_slice %45 {offsets = [0, 64], sizes = [2, 64], strides = [1, 1]} : vector<2x192xf32> to vector<2x64xf32>
    %56 = arith.addf %54, %55 : vector<2x64xf32>
    %57 = arith.negf %56 : vector<2x64xf32>
    %58 = math.exp %57 : vector<2x64xf32>
    %cst_18 = arith.constant 1.000000e+00 : f32
    %59 = vector.broadcast %cst_18 : f32 to vector<2x64xf32>
    %60 = arith.addf %59, %58 : vector<2x64xf32>
    %61 = arith.divf %59, %60 : vector<2x64xf32>
    %62 = vector.extract_strided_slice %44 {offsets = [0, 128], sizes = [2, 64], strides = [1, 1]} : vector<2x192xf32> to vector<2x64xf32>
    %63 = vector.extract_strided_slice %45 {offsets = [0, 128], sizes = [2, 64], strides = [1, 1]} : vector<2x192xf32> to vector<2x64xf32>
    %64 = arith.addf %63, %9 : vector<2x64xf32>
    %65 = arith.mulf %53, %64 : vector<2x64xf32>
    %66 = arith.addf %62, %65 : vector<2x64xf32>
    %67 = math.tanh %66 : vector<2x64xf32>
    %cst_19 = arith.constant 1.000000e+00 : f32
    %68 = vector.broadcast %cst_19 : f32 to vector<2x64xf32>
    %69 = arith.subf %68, %61 : vector<2x64xf32>
    %70 = arith.mulf %69, %67 : vector<2x64xf32>
    %71 = arith.mulf %61, %39 : vector<2x64xf32>
    %72 = arith.addf %70, %71 : vector<2x64xf32>
    %73 = vector.extract_strided_slice %72 {offsets = [0, 0], sizes = [2, 32], strides = [1, 1]} : vector<2x64xf32> to vector<2x32xf32>
    %c2 = arith.constant 2 : index
    %c0_20 = arith.constant 0 : index
    %74 = vector.load %arg9[%c2, %c0_20] : memref<16x64xf32, #tpu.memory_space<vmem>>, vector<2x32xf32>
    tpu.vector_store %arg9[%c2, %c0_20], %73 {strides = array<i32>} : memref<16x64xf32, #tpu.memory_space<vmem>>, vector<2x32xf32>,
    %75 = vector.extract_strided_slice %72 {offsets = [0, 32], sizes = [2, 32], strides = [1, 1]} : vector<2x64xf32> to vector<2x32xf32>
    %c12 = arith.constant 12 : index
    %c32_21 = arith.constant 32 : index
    %76 = vector.load %arg9[%c12, %c32_21] : memref<16x64xf32, #tpu.memory_space<vmem>>, vector<2x32xf32>
    tpu.vector_store %arg9[%c12, %c32_21], %75 {strides = array<i32>} : memref<16x64xf32, #tpu.memory_space<vmem>>, vector<2x32xf32>,
    %77 = vector.extract_strided_slice %5 {offsets = [4, 0], sizes = [2, 192], strides = [1, 1]} : vector<16x192xf32> to vector<2x192xf32>
    %cst_22 = arith.constant dense<0.000000e+00> : vector<2x192xf32>
    %78 = tpu.matmul %72, %6, %cst_22 {dimension_numbers = #tpu.dot_dimension_numbers<[1], [0], [0], [1], [0, 0, 1, 1], [], []>} : vector<2x64xf32>, vector<64x192xf32>, vector<2x192xf32> -> vector<2x192xf32>
    %79 = vector.extract_strided_slice %77 {offsets = [0, 0], sizes = [2, 64], strides = [1, 1]} : vector<2x192xf32> to vector<2x64xf32>
    %80 = vector.extract_strided_slice %78 {offsets = [0, 0], sizes = [2, 64], strides = [1, 1]} : vector<2x192xf32> to vector<2x64xf32>
    %81 = arith.addf %79, %80 : vector<2x64xf32>
    %82 = arith.negf %81 : vector<2x64xf32>
    %83 = math.exp %82 : vector<2x64xf32>
    %cst_23 = arith.constant 1.000000e+00 : f32
    %84 = vector.broadcast %cst_23 : f32 to vector<2x64xf32>
    %85 = arith.addf %84, %83 : vector<2x64xf32>
    %86 = arith.divf %84, %85 : vector<2x64xf32>
    %87 = vector.extract_strided_slice %77 {offsets = [0, 64], sizes = [2, 64], strides = [1, 1]} : vector<2x192xf32> to vector<2x64xf32>
    %88 = vector.extract_strided_slice %78 {offsets = [0, 64], sizes = [2, 64], strides = [1, 1]} : vector<2x192xf32> to vector<2x64xf32>
    %89 = arith.addf %87, %88 : vector<2x64xf32>
    %90 = arith.negf %89 : vector<2x64xf32>
    %91 = math.exp %90 : vector<2x64xf32>
    %cst_24 = arith.constant 1.000000e+00 : f32
    %92 = vector.broadcast %cst_24 : f32 to vector<2x64xf32>
    %93 = arith.addf %92, %91 : vector<2x64xf32>
    %94 = arith.divf %92, %93 : vector<2x64xf32>
    %95 = vector.extract_strided_slice %77 {offsets = [0, 128], sizes = [2, 64], strides = [1, 1]} : vector<2x192xf32> to vector<2x64xf32>
    %96 = vector.extract_strided_slice %78 {offsets = [0, 128], sizes = [2, 64], strides = [1, 1]} : vector<2x192xf32> to vector<2x64xf32>
    %97 = arith.addf %96, %9 : vector<2x64xf32>
    %98 = arith.mulf %86, %97 : vector<2x64xf32>
    %99 = arith.addf %95, %98 : vector<2x64xf32>
    %100 = math.tanh %99 : vector<2x64xf32>
    %cst_25 = arith.constant 1.000000e+00 : f32
    %101 = vector.broadcast %cst_25 : f32 to vector<2x64xf32>
    %102 = arith.subf %101, %94 : vector<2x64xf32>
    %103 = arith.mulf %102, %100 : vector<2x64xf32>
    %104 = arith.mulf %94, %72 : vector<2x64xf32>
    %105 = arith.addf %103, %104 : vector<2x64xf32>
    %106 = vector.extract_strided_slice %105 {offsets = [0, 0], sizes = [2, 32], strides = [1, 1]} : vector<2x64xf32> to vector<2x32xf32>
    %c4 = arith.constant 4 : index
    %c0_26 = arith.constant 0 : index
    %107 = vector.load %arg9[%c4, %c0_26] : memref<16x64xf32, #tpu.memory_space<vmem>>, vector<2x32xf32>
    tpu.vector_store %arg9[%c4, %c0_26], %106 {strides = array<i32>} : memref<16x64xf32, #tpu.memory_space<vmem>>, vector<2x32xf32>,
    %108 = vector.extract_strided_slice %105 {offsets = [0, 32], sizes = [2, 32], strides = [1, 1]} : vector<2x64xf32> to vector<2x32xf32>
    %c10 = arith.constant 10 : index
    %c32_27 = arith.constant 32 : index
    %109 = vector.load %arg9[%c10, %c32_27] : memref<16x64xf32, #tpu.memory_space<vmem>>, vector<2x32xf32>
    tpu.vector_store %arg9[%c10, %c32_27], %108 {strides = array<i32>} : memref<16x64xf32, #tpu.memory_space<vmem>>, vector<2x32xf32>,
    %110 = vector.extract_strided_slice %5 {offsets = [6, 0], sizes = [2, 192], strides = [1, 1]} : vector<16x192xf32> to vector<2x192xf32>
    %cst_28 = arith.constant dense<0.000000e+00> : vector<2x192xf32>
    %111 = tpu.matmul %105, %6, %cst_28 {dimension_numbers = #tpu.dot_dimension_numbers<[1], [0], [0], [1], [0, 0, 1, 1], [], []>} : vector<2x64xf32>, vector<64x192xf32>, vector<2x192xf32> -> vector<2x192xf32>
    %112 = vector.extract_strided_slice %110 {offsets = [0, 0], sizes = [2, 64], strides = [1, 1]} : vector<2x192xf32> to vector<2x64xf32>
    %113 = vector.extract_strided_slice %111 {offsets = [0, 0], sizes = [2, 64], strides = [1, 1]} : vector<2x192xf32> to vector<2x64xf32>
    %114 = arith.addf %112, %113 : vector<2x64xf32>
    %115 = arith.negf %114 : vector<2x64xf32>
    %116 = math.exp %115 : vector<2x64xf32>
    %cst_29 = arith.constant 1.000000e+00 : f32
    %117 = vector.broadcast %cst_29 : f32 to vector<2x64xf32>
    %118 = arith.addf %117, %116 : vector<2x64xf32>
    %119 = arith.divf %117, %118 : vector<2x64xf32>
    %120 = vector.extract_strided_slice %110 {offsets = [0, 64], sizes = [2, 64], strides = [1, 1]} : vector<2x192xf32> to vector<2x64xf32>
    %121 = vector.extract_strided_slice %111 {offsets = [0, 64], sizes = [2, 64], strides = [1, 1]} : vector<2x192xf32> to vector<2x64xf32>
    %122 = arith.addf %120, %121 : vector<2x64xf32>
    %123 = arith.negf %122 : vector<2x64xf32>
    %124 = math.exp %123 : vector<2x64xf32>
    %cst_30 = arith.constant 1.000000e+00 : f32
    %125 = vector.broadcast %cst_30 : f32 to vector<2x64xf32>
    %126 = arith.addf %125, %124 : vector<2x64xf32>
    %127 = arith.divf %125, %126 : vector<2x64xf32>
    %128 = vector.extract_strided_slice %110 {offsets = [0, 128], sizes = [2, 64], strides = [1, 1]} : vector<2x192xf32> to vector<2x64xf32>
    %129 = vector.extract_strided_slice %111 {offsets = [0, 128], sizes = [2, 64], strides = [1, 1]} : vector<2x192xf32> to vector<2x64xf32>
    %130 = arith.addf %129, %9 : vector<2x64xf32>
    %131 = arith.mulf %119, %130 : vector<2x64xf32>
    %132 = arith.addf %128, %131 : vector<2x64xf32>
    %133 = math.tanh %132 : vector<2x64xf32>
    %cst_31 = arith.constant 1.000000e+00 : f32
    %134 = vector.broadcast %cst_31 : f32 to vector<2x64xf32>
    %135 = arith.subf %134, %127 : vector<2x64xf32>
    %136 = arith.mulf %135, %133 : vector<2x64xf32>
    %137 = arith.mulf %127, %105 : vector<2x64xf32>
    %138 = arith.addf %136, %137 : vector<2x64xf32>
    %139 = vector.extract_strided_slice %138 {offsets = [0, 0], sizes = [2, 32], strides = [1, 1]} : vector<2x64xf32> to vector<2x32xf32>
    %c6 = arith.constant 6 : index
    %c0_32 = arith.constant 0 : index
    %140 = vector.load %arg9[%c6, %c0_32] : memref<16x64xf32, #tpu.memory_space<vmem>>, vector<2x32xf32>
    tpu.vector_store %arg9[%c6, %c0_32], %139 {strides = array<i32>} : memref<16x64xf32, #tpu.memory_space<vmem>>, vector<2x32xf32>,
    %141 = vector.extract_strided_slice %138 {offsets = [0, 32], sizes = [2, 32], strides = [1, 1]} : vector<2x64xf32> to vector<2x32xf32>
    %c8 = arith.constant 8 : index
    %c32_33 = arith.constant 32 : index
    %142 = vector.load %arg9[%c8, %c32_33] : memref<16x64xf32, #tpu.memory_space<vmem>>, vector<2x32xf32>
    tpu.vector_store %arg9[%c8, %c32_33], %141 {strides = array<i32>} : memref<16x64xf32, #tpu.memory_space<vmem>>, vector<2x32xf32>,
    %143 = vector.extract_strided_slice %5 {offsets = [8, 0], sizes = [2, 192], strides = [1, 1]} : vector<16x192xf32> to vector<2x192xf32>
    %cst_34 = arith.constant dense<0.000000e+00> : vector<2x192xf32>
    %144 = tpu.matmul %138, %6, %cst_34 {dimension_numbers = #tpu.dot_dimension_numbers<[1], [0], [0], [1], [0, 0, 1, 1], [], []>} : vector<2x64xf32>, vector<64x192xf32>, vector<2x192xf32> -> vector<2x192xf32>
    %145 = vector.extract_strided_slice %143 {offsets = [0, 0], sizes = [2, 64], strides = [1, 1]} : vector<2x192xf32> to vector<2x64xf32>
    %146 = vector.extract_strided_slice %144 {offsets = [0, 0], sizes = [2, 64], strides = [1, 1]} : vector<2x192xf32> to vector<2x64xf32>
    %147 = arith.addf %145, %146 : vector<2x64xf32>
    %148 = arith.negf %147 : vector<2x64xf32>
    %149 = math.exp %148 : vector<2x64xf32>
    %cst_35 = arith.constant 1.000000e+00 : f32
    %150 = vector.broadcast %cst_35 : f32 to vector<2x64xf32>
    %151 = arith.addf %150, %149 : vector<2x64xf32>
    %152 = arith.divf %150, %151 : vector<2x64xf32>
    %153 = vector.extract_strided_slice %143 {offsets = [0, 64], sizes = [2, 64], strides = [1, 1]} : vector<2x192xf32> to vector<2x64xf32>
    %154 = vector.extract_strided_slice %144 {offsets = [0, 64], sizes = [2, 64], strides = [1, 1]} : vector<2x192xf32> to vector<2x64xf32>
    %155 = arith.addf %153, %154 : vector<2x64xf32>
    %156 = arith.negf %155 : vector<2x64xf32>
    %157 = math.exp %156 : vector<2x64xf32>
    %cst_36 = arith.constant 1.000000e+00 : f32
    %158 = vector.broadcast %cst_36 : f32 to vector<2x64xf32>
    %159 = arith.addf %158, %157 : vector<2x64xf32>
    %160 = arith.divf %158, %159 : vector<2x64xf32>
    %161 = vector.extract_strided_slice %143 {offsets = [0, 128], sizes = [2, 64], strides = [1, 1]} : vector<2x192xf32> to vector<2x64xf32>
    %162 = vector.extract_strided_slice %144 {offsets = [0, 128], sizes = [2, 64], strides = [1, 1]} : vector<2x192xf32> to vector<2x64xf32>
    %163 = arith.addf %162, %9 : vector<2x64xf32>
    %164 = arith.mulf %152, %163 : vector<2x64xf32>
    %165 = arith.addf %161, %164 : vector<2x64xf32>
    %166 = math.tanh %165 : vector<2x64xf32>
    %cst_37 = arith.constant 1.000000e+00 : f32
    %167 = vector.broadcast %cst_37 : f32 to vector<2x64xf32>
    %168 = arith.subf %167, %160 : vector<2x64xf32>
    %169 = arith.mulf %168, %166 : vector<2x64xf32>
    %170 = arith.mulf %160, %138 : vector<2x64xf32>
    %171 = arith.addf %169, %170 : vector<2x64xf32>
    %172 = vector.extract_strided_slice %171 {offsets = [0, 0], sizes = [2, 32], strides = [1, 1]} : vector<2x64xf32> to vector<2x32xf32>
    %c8_38 = arith.constant 8 : index
    %c0_39 = arith.constant 0 : index
    %173 = vector.load %arg9[%c8_38, %c0_39] : memref<16x64xf32, #tpu.memory_space<vmem>>, vector<2x32xf32>
    tpu.vector_store %arg9[%c8_38, %c0_39], %172 {strides = array<i32>} : memref<16x64xf32, #tpu.memory_space<vmem>>, vector<2x32xf32>,
    %174 = vector.extract_strided_slice %171 {offsets = [0, 32], sizes = [2, 32], strides = [1, 1]} : vector<2x64xf32> to vector<2x32xf32>
    %c6_40 = arith.constant 6 : index
    %c32_41 = arith.constant 32 : index
    %175 = vector.load %arg9[%c6_40, %c32_41] : memref<16x64xf32, #tpu.memory_space<vmem>>, vector<2x32xf32>
    tpu.vector_store %arg9[%c6_40, %c32_41], %174 {strides = array<i32>} : memref<16x64xf32, #tpu.memory_space<vmem>>, vector<2x32xf32>,
    %176 = vector.extract_strided_slice %5 {offsets = [10, 0], sizes = [2, 192], strides = [1, 1]} : vector<16x192xf32> to vector<2x192xf32>
    %cst_42 = arith.constant dense<0.000000e+00> : vector<2x192xf32>
    %177 = tpu.matmul %171, %6, %cst_42 {dimension_numbers = #tpu.dot_dimension_numbers<[1], [0], [0], [1], [0, 0, 1, 1], [], []>} : vector<2x64xf32>, vector<64x192xf32>, vector<2x192xf32> -> vector<2x192xf32>
    %178 = vector.extract_strided_slice %176 {offsets = [0, 0], sizes = [2, 64], strides = [1, 1]} : vector<2x192xf32> to vector<2x64xf32>
    %179 = vector.extract_strided_slice %177 {offsets = [0, 0], sizes = [2, 64], strides = [1, 1]} : vector<2x192xf32> to vector<2x64xf32>
    %180 = arith.addf %178, %179 : vector<2x64xf32>
    %181 = arith.negf %180 : vector<2x64xf32>
    %182 = math.exp %181 : vector<2x64xf32>
    %cst_43 = arith.constant 1.000000e+00 : f32
    %183 = vector.broadcast %cst_43 : f32 to vector<2x64xf32>
    %184 = arith.addf %183, %182 : vector<2x64xf32>
    %185 = arith.divf %183, %184 : vector<2x64xf32>
    %186 = vector.extract_strided_slice %176 {offsets = [0, 64], sizes = [2, 64], strides = [1, 1]} : vector<2x192xf32> to vector<2x64xf32>
    %187 = vector.extract_strided_slice %177 {offsets = [0, 64], sizes = [2, 64], strides = [1, 1]} : vector<2x192xf32> to vector<2x64xf32>
    %188 = arith.addf %186, %187 : vector<2x64xf32>
    %189 = arith.negf %188 : vector<2x64xf32>
    %190 = math.exp %189 : vector<2x64xf32>
    %cst_44 = arith.constant 1.000000e+00 : f32
    %191 = vector.broadcast %cst_44 : f32 to vector<2x64xf32>
    %192 = arith.addf %191, %190 : vector<2x64xf32>
    %193 = arith.divf %191, %192 : vector<2x64xf32>
    %194 = vector.extract_strided_slice %176 {offsets = [0, 128], sizes = [2, 64], strides = [1, 1]} : vector<2x192xf32> to vector<2x64xf32>
    %195 = vector.extract_strided_slice %177 {offsets = [0, 128], sizes = [2, 64], strides = [1, 1]} : vector<2x192xf32> to vector<2x64xf32>
    %196 = arith.addf %195, %9 : vector<2x64xf32>
    %197 = arith.mulf %185, %196 : vector<2x64xf32>
    %198 = arith.addf %194, %197 : vector<2x64xf32>
    %199 = math.tanh %198 : vector<2x64xf32>
    %cst_45 = arith.constant 1.000000e+00 : f32
    %200 = vector.broadcast %cst_45 : f32 to vector<2x64xf32>
    %201 = arith.subf %200, %193 : vector<2x64xf32>
    %202 = arith.mulf %201, %199 : vector<2x64xf32>
    %203 = arith.mulf %193, %171 : vector<2x64xf32>
    %204 = arith.addf %202, %203 : vector<2x64xf32>
    %205 = vector.extract_strided_slice %204 {offsets = [0, 0], sizes = [2, 32], strides = [1, 1]} : vector<2x64xf32> to vector<2x32xf32>
    %c10_46 = arith.constant 10 : index
    %c0_47 = arith.constant 0 : index
    %206 = vector.load %arg9[%c10_46, %c0_47] : memref<16x64xf32, #tpu.memory_space<vmem>>, vector<2x32xf32>
    tpu.vector_store %arg9[%c10_46, %c0_47], %205 {strides = array<i32>} : memref<16x64xf32, #tpu.memory_space<vmem>>, vector<2x32xf32>,
    %207 = vector.extract_strided_slice %204 {offsets = [0, 32], sizes = [2, 32], strides = [1, 1]} : vector<2x64xf32> to vector<2x32xf32>
    %c4_48 = arith.constant 4 : index
    %c32_49 = arith.constant 32 : index
    %208 = vector.load %arg9[%c4_48, %c32_49] : memref<16x64xf32, #tpu.memory_space<vmem>>, vector<2x32xf32>
    tpu.vector_store %arg9[%c4_48, %c32_49], %207 {strides = array<i32>} : memref<16x64xf32, #tpu.memory_space<vmem>>, vector<2x32xf32>,
    %209 = vector.extract_strided_slice %5 {offsets = [12, 0], sizes = [2, 192], strides = [1, 1]} : vector<16x192xf32> to vector<2x192xf32>
    %cst_50 = arith.constant dense<0.000000e+00> : vector<2x192xf32>
    %210 = tpu.matmul %204, %6, %cst_50 {dimension_numbers = #tpu.dot_dimension_numbers<[1], [0], [0], [1], [0, 0, 1, 1], [], []>} : vector<2x64xf32>, vector<64x192xf32>, vector<2x192xf32> -> vector<2x192xf32>
    %211 = vector.extract_strided_slice %209 {offsets = [0, 0], sizes = [2, 64], strides = [1, 1]} : vector<2x192xf32> to vector<2x64xf32>
    %212 = vector.extract_strided_slice %210 {offsets = [0, 0], sizes = [2, 64], strides = [1, 1]} : vector<2x192xf32> to vector<2x64xf32>
    %213 = arith.addf %211, %212 : vector<2x64xf32>
    %214 = arith.negf %213 : vector<2x64xf32>
    %215 = math.exp %214 : vector<2x64xf32>
    %cst_51 = arith.constant 1.000000e+00 : f32
    %216 = vector.broadcast %cst_51 : f32 to vector<2x64xf32>
    %217 = arith.addf %216, %215 : vector<2x64xf32>
    %218 = arith.divf %216, %217 : vector<2x64xf32>
    %219 = vector.extract_strided_slice %209 {offsets = [0, 64], sizes = [2, 64], strides = [1, 1]} : vector<2x192xf32> to vector<2x64xf32>
    %220 = vector.extract_strided_slice %210 {offsets = [0, 64], sizes = [2, 64], strides = [1, 1]} : vector<2x192xf32> to vector<2x64xf32>
    %221 = arith.addf %219, %220 : vector<2x64xf32>
    %222 = arith.negf %221 : vector<2x64xf32>
    %223 = math.exp %222 : vector<2x64xf32>
    %cst_52 = arith.constant 1.000000e+00 : f32
    %224 = vector.broadcast %cst_52 : f32 to vector<2x64xf32>
    %225 = arith.addf %224, %223 : vector<2x64xf32>
    %226 = arith.divf %224, %225 : vector<2x64xf32>
    %227 = vector.extract_strided_slice %209 {offsets = [0, 128], sizes = [2, 64], strides = [1, 1]} : vector<2x192xf32> to vector<2x64xf32>
    %228 = vector.extract_strided_slice %210 {offsets = [0, 128], sizes = [2, 64], strides = [1, 1]} : vector<2x192xf32> to vector<2x64xf32>
    %229 = arith.addf %228, %9 : vector<2x64xf32>
    %230 = arith.mulf %218, %229 : vector<2x64xf32>
    %231 = arith.addf %227, %230 : vector<2x64xf32>
    %232 = math.tanh %231 : vector<2x64xf32>
    %cst_53 = arith.constant 1.000000e+00 : f32
    %233 = vector.broadcast %cst_53 : f32 to vector<2x64xf32>
    %234 = arith.subf %233, %226 : vector<2x64xf32>
    %235 = arith.mulf %234, %232 : vector<2x64xf32>
    %236 = arith.mulf %226, %204 : vector<2x64xf32>
    %237 = arith.addf %235, %236 : vector<2x64xf32>
    %238 = vector.extract_strided_slice %237 {offsets = [0, 0], sizes = [2, 32], strides = [1, 1]} : vector<2x64xf32> to vector<2x32xf32>
    %c12_54 = arith.constant 12 : index
    %c0_55 = arith.constant 0 : index
    %239 = vector.load %arg9[%c12_54, %c0_55] : memref<16x64xf32, #tpu.memory_space<vmem>>, vector<2x32xf32>
    tpu.vector_store %arg9[%c12_54, %c0_55], %238 {strides = array<i32>} : memref<16x64xf32, #tpu.memory_space<vmem>>, vector<2x32xf32>,
    %240 = vector.extract_strided_slice %237 {offsets = [0, 32], sizes = [2, 32], strides = [1, 1]} : vector<2x64xf32> to vector<2x32xf32>
    %c2_56 = arith.constant 2 : index
    %c32_57 = arith.constant 32 : index
    %241 = vector.load %arg9[%c2_56, %c32_57] : memref<16x64xf32, #tpu.memory_space<vmem>>, vector<2x32xf32>
    tpu.vector_store %arg9[%c2_56, %c32_57], %240 {strides = array<i32>} : memref<16x64xf32, #tpu.memory_space<vmem>>, vector<2x32xf32>,
    %242 = vector.extract_strided_slice %5 {offsets = [14, 0], sizes = [2, 192], strides = [1, 1]} : vector<16x192xf32> to vector<2x192xf32>
    %cst_58 = arith.constant dense<0.000000e+00> : vector<2x192xf32>
    %243 = tpu.matmul %237, %6, %cst_58 {dimension_numbers = #tpu.dot_dimension_numbers<[1], [0], [0], [1], [0, 0, 1, 1], [], []>} : vector<2x64xf32>, vector<64x192xf32>, vector<2x192xf32> -> vector<2x192xf32>
    %244 = vector.extract_strided_slice %242 {offsets = [0, 0], sizes = [2, 64], strides = [1, 1]} : vector<2x192xf32> to vector<2x64xf32>
    %245 = vector.extract_strided_slice %243 {offsets = [0, 0], sizes = [2, 64], strides = [1, 1]} : vector<2x192xf32> to vector<2x64xf32>
    %246 = arith.addf %244, %245 : vector<2x64xf32>
    %247 = arith.negf %246 : vector<2x64xf32>
    %248 = math.exp %247 : vector<2x64xf32>
    %cst_59 = arith.constant 1.000000e+00 : f32
    %249 = vector.broadcast %cst_59 : f32 to vector<2x64xf32>
    %250 = arith.addf %249, %248 : vector<2x64xf32>
    %251 = arith.divf %249, %250 : vector<2x64xf32>
    %252 = vector.extract_strided_slice %242 {offsets = [0, 64], sizes = [2, 64], strides = [1, 1]} : vector<2x192xf32> to vector<2x64xf32>
    %253 = vector.extract_strided_slice %243 {offsets = [0, 64], sizes = [2, 64], strides = [1, 1]} : vector<2x192xf32> to vector<2x64xf32>
    %254 = arith.addf %252, %253 : vector<2x64xf32>
    %255 = arith.negf %254 : vector<2x64xf32>
    %256 = math.exp %255 : vector<2x64xf32>
    %cst_60 = arith.constant 1.000000e+00 : f32
    %257 = vector.broadcast %cst_60 : f32 to vector<2x64xf32>
    %258 = arith.addf %257, %256 : vector<2x64xf32>
    %259 = arith.divf %257, %258 : vector<2x64xf32>
    %260 = vector.extract_strided_slice %242 {offsets = [0, 128], sizes = [2, 64], strides = [1, 1]} : vector<2x192xf32> to vector<2x64xf32>
    %261 = vector.extract_strided_slice %243 {offsets = [0, 128], sizes = [2, 64], strides = [1, 1]} : vector<2x192xf32> to vector<2x64xf32>
    %262 = arith.addf %261, %9 : vector<2x64xf32>
    %263 = arith.mulf %251, %262 : vector<2x64xf32>
    %264 = arith.addf %260, %263 : vector<2x64xf32>
    %265 = math.tanh %264 : vector<2x64xf32>
    %cst_61 = arith.constant 1.000000e+00 : f32
    %266 = vector.broadcast %cst_61 : f32 to vector<2x64xf32>
    %267 = arith.subf %266, %259 : vector<2x64xf32>
    %268 = arith.mulf %267, %265 : vector<2x64xf32>
    %269 = arith.mulf %259, %237 : vector<2x64xf32>
    %270 = arith.addf %268, %269 : vector<2x64xf32>
    %271 = vector.extract_strided_slice %270 {offsets = [0, 0], sizes = [2, 32], strides = [1, 1]} : vector<2x64xf32> to vector<2x32xf32>
    %c14_62 = arith.constant 14 : index
    %c0_63 = arith.constant 0 : index
    %272 = vector.load %arg9[%c14_62, %c0_63] : memref<16x64xf32, #tpu.memory_space<vmem>>, vector<2x32xf32>
    tpu.vector_store %arg9[%c14_62, %c0_63], %271 {strides = array<i32>} : memref<16x64xf32, #tpu.memory_space<vmem>>, vector<2x32xf32>,
    %273 = vector.extract_strided_slice %270 {offsets = [0, 32], sizes = [2, 32], strides = [1, 1]} : vector<2x64xf32> to vector<2x32xf32>
    %c0_64 = arith.constant 0 : index
    %c32_65 = arith.constant 32 : index
    %274 = vector.load %arg9[%c0_64, %c32_65] : memref<16x64xf32, #tpu.memory_space<vmem>>, vector<2x32xf32>
    tpu.vector_store %arg9[%c0_64, %c32_65], %273 {strides = array<i32>} : memref<16x64xf32, #tpu.memory_space<vmem>>, vector<2x32xf32>,
    %275 = vector.extract_strided_slice %270 {offsets = [0, 0], sizes = [2, 32], strides = [1, 1]} : vector<2x64xf32> to vector<2x32xf32>
    %c0_66 = arith.constant 0 : index
    %c0_67 = arith.constant 0 : index
    %c0_68 = arith.constant 0 : index
    %276 = vector.load %arg8[%c0_66, %c0_67, %c0_68] : memref<2x2x32xf32, #tpu.memory_space<vmem>>, vector<1x2x32xf32>
    %277 = vector.shape_cast %276 : vector<1x2x32xf32> to vector<2x32xf32>
    %278 = vector.shape_cast %275 : vector<2x32xf32> to vector<1x2x32xf32>
    tpu.vector_store %arg8[%c0_66, %c0_67, %c0_68], %278 {strides = array<i32>} : memref<2x2x32xf32, #tpu.memory_space<vmem>>, vector<1x2x32xf32>,
    %279 = vector.extract_strided_slice %270 {offsets = [0, 32], sizes = [2, 32], strides = [1, 1]} : vector<2x64xf32> to vector<2x32xf32>
    %c1 = arith.constant 1 : index
    %c0_69 = arith.constant 0 : index
    %c0_70 = arith.constant 0 : index
    %280 = vector.load %arg8[%c1, %c0_69, %c0_70] : memref<2x2x32xf32, #tpu.memory_space<vmem>>, vector<1x2x32xf32>
    %281 = vector.shape_cast %280 : vector<1x2x32xf32> to vector<2x32xf32>
    %282 = vector.shape_cast %279 : vector<2x32xf32> to vector<1x2x32xf32>
    tpu.vector_store %arg8[%c1, %c0_69, %c0_70], %282 {strides = array<i32>} : memref<2x2x32xf32, #tpu.memory_space<vmem>>, vector<1x2x32xf32>,
    %c0_71 = arith.constant 0 : index
    %c0_72 = arith.constant 0 : index
    %283 = vector.load %arg9[%c0_71, %c0_72] : memref<16x64xf32, #tpu.memory_space<vmem>>, vector<16x64xf32>
    %c0_73 = arith.constant 0 : index
    %c0_74 = arith.constant 0 : index
    %284 = vector.load %arg5[%c0_73, %c0_74] : memref<64x16xf32, #tpu.memory_space<vmem>>, vector<64x16xf32>
    %cst_75 = arith.constant dense<0.000000e+00> : vector<16x16xf32>
    %285 = tpu.matmul %283, %284, %cst_75 {dimension_numbers = #tpu.dot_dimension_numbers<[1], [0], [0], [1], [0, 0, 1, 1], [], []>} : vector<16x64xf32>, vector<64x16xf32>, vector<16x16xf32> -> vector<16x16xf32>
    %c0_76 = arith.constant 0 : index
    %c0_77 = arith.constant 0 : index
    %286 = vector.load %arg6[%c0_76, %c0_77] : memref<1x16xf32, #tpu.memory_space<vmem>>, vector<1x16xf32>
    %287 = vector.broadcast %286 : vector<1x16xf32> to vector<16x16xf32>
    %288 = arith.addf %285, %287 : vector<16x16xf32>
    %c0_78 = arith.constant 0 : index
    %c0_79 = arith.constant 0 : index
    %289 = vector.load %arg7[%c0_78, %c0_79] : memref<16x16xf32, #tpu.memory_space<vmem>>, vector<16x16xf32>
    tpu.vector_store %arg7[%c0_78, %c0_79], %288 {strides = array<i32>} : memref<16x16xf32, #tpu.memory_space<vmem>>, vector<16x16xf32>,
    return
  }
}

</mosaic_0001>

<bundles_post_ra>
// kernel: tpu_custom_call.1
= control target key start
LH: loop header
LB: loop body
LE: loop exit
PB: predicated region body
PF: predicated region fallthrough
CT: control target
= control target key end

     0   :  { %14 = vsyncpa [#allocation4], 0  ;;  %s1919_s0 = inlined_call_operand.vmem [shape: f32[16,64], index: 0, kind: input, shape index: {}]   ;;  %s1920_s1 = inlined_call_operand.hbm [shape: f32[64,192], index: 1, kind: input, shape index: {}]   ;;  %s1921_s2 = inlined_call_operand.vmem [shape: f32[1,192], index: 2, kind: input, shape index: {}]   ;;  %s1922_s3 = inlined_call_operand.hbm [shape: f32[64,192], index: 3, kind: input, shape index: {}]   ;;  %s1923_s4 = inlined_call_operand.vmem [shape: f32[1,64], index: 4, kind: input, shape index: {}]   ;;  %s1924_s5 = inlined_call_operand.vmem [shape: f32[64,16], index: 5, kind: input, shape index: {}]   ;;  %s1925_s6 = inlined_call_operand.vmem [shape: f32[1,16], index: 6, kind: input, shape index: {}]   ;;  %s1926_s7 = inlined_call_operand.hbm [shape: f32[16,16], index: 7, kind: output, shape index: {0}]   ;;  %s1927_s8 = inlined_call_operand.hbm [shape: f32[2,2,32], index: 8, kind: output, shape index: {1}]  }
   0x1   :  { %15 = vsyncpa [#allocation7], 0 }
   0x2   :  { %16 = vsyncpa [#allocation5], 0 }
   0x3   :  { %17 = vsyncpa [#allocation10], 0  ;;  %s1559_s27 = smov [#allocation3]   ;;  %s1463_s9 = scalar_lea.hbm %s1920_s1, 2048 }
   0x4   :  { %s25_s28 = sshll.u32 %s1559_s27, 4  ;;  %p1464_p0 = scmp.ne.s32.totalorder %s1920_s1, %s1463_s9  ;;  %s26_s28 = int_to_ptr.vmem [resolvable:$true] %s25_s28 }
   0x5   :  { %p1467_p1 = scmp.lt.u32.totalorder %s1463_s9, %s1920_s1 }
   0x7   :  { %p1469_p2 = pnand %p1467_p1, %p1464_p0 }
   0x9   :  { %1472 = shalt.err (!%p1469_p2)
}
   0xa   :  { %s1473_s14 = scalar_lea.vmem %s26_s28, 2048  ;;  %p1478_p4 = scmp.lt.s32.totalorder %s26_s28, %s26_s28 }
   0xb   :  { %p1474_p3 = scmp.ne.s32.totalorder %s26_s28, %s1473_s14  ;;  %p1479_p5 = scmp.lt.s32.totalorder %s1473_s14, %s1473_s14 }
   0xd   :  { %p1480_p6 = por %p1479_p5, %p1478_p4 }
   0xf   :  { %p1481_p7 = pnand %p1480_p6, %p1474_p3 }
  0x11   :  { %1484 = shalt.err (!%p1481_p7)
}
  0x12   :  { %s1560_s15 = smov 256   ;;  %s1561_s16 = smov 16  }
  0x13   :  { %31 = dma.hbm_to_vmem [thread:$0]  %s1920_s1, 2048, %s26_s28, [#allocation4], %s1560_s15, %s1560_s15, %s1561_s16  }
  0x14   :  { %s1562_s19 = smov [#allocation6]   ;;  %s1485_s23 = scalar_lea.hbm %s1922_s3, 2048 }
  0x15   :  { %s39_s20 = sshll.u32 %s1562_s19, 4  ;;  %p1486_p8 = scmp.ne.s32.totalorder %s1922_s3, %s1485_s23  ;;  %s40_s20 = int_to_ptr.vmem [resolvable:$true] %s39_s20 }
  0x16   :  { %p1489_p9 = scmp.lt.u32.totalorder %s1485_s23, %s1922_s3 }
  0x18   :  { %p1491_p10 = pnand %p1489_p9, %p1486_p8 }
  0x1a   :  { %1494 = shalt.err (!%p1491_p10)
}
  0x1b   :  { %s1495_s29 = scalar_lea.vmem %s40_s20, 2048  ;;  %p1500_p12 = scmp.lt.s32.totalorder %s40_s20, %s40_s20 }
  0x1c   :  { %p1496_p11 = scmp.ne.s32.totalorder %s40_s20, %s1495_s29  ;;  %p1501_p13 = scmp.lt.s32.totalorder %s1495_s29, %s1495_s29 }
  0x1e   :  { %p1502_p0 = por %p1501_p13, %p1500_p12 }
  0x20   :  { %p1503_p1 = pnand %p1502_p0, %p1496_p11 }
  0x22   :  { %1506 = shalt.err (!%p1503_p1)
}
  0x23   :  { %45 = dma.hbm_to_vmem [thread:$0]  %s1922_s3, 2048, %s40_s20, [#allocation7], %s1560_s15, %s1560_s15, %s1561_s16  }
  0x24   :  { %1551 = dma.done.wait [#allocation4], 2048  }
  0x25   :  { %1552 = vsyncadd [#allocation4], 4294965248 }
  0x26   :  { %1553 = dma.done.wait [#allocation7], 2048  }
  0x27   :  { %1554 = vsyncadd [#allocation7], 4294965248  ;;  %v1563_v0 = vmov 0.0   ;;  %v61_v1 = vld [vmem:[#allocation3 + $0x8] sm:$0xff]  ;;  %v63_v2 = vld [vmem:[#allocation3 + $0x18] sm:$0xff]  ;;  %vm88_vm0 = vcmask 523264   ;;  %v78_v50 = vlaneseq }
  0x28   :  { %159 = vmatprep.mubr.f32.mxu0 %v1563_v0  ;;  %262 = vmatprep.mubr.f32.mxu1 %v1563_v0  ;;  %v60_v3 = vld [vmem:[#allocation3] sm:$0xff]  ;;  %v1243_v4 = vpack.c.bf16 %v63_v2, %v61_v1  ;;  %v62_v5 = vld [vmem:[#allocation3 + $0x10] sm:$0xff]  ;;  %v173_v6 = vld [vmem:[#allocation6 + $0x8] sm:$0xff]  ;;  %vm292_vm1 = vcmask 254976   ;;  %vm294_vm2 = vcmask 517376   ;;  %vm400_vm3 = vcmask 257026  }
  0x29   :  { %v175_v7 = vld [vmem:[#allocation6 + $0x18] sm:$0xff]  ;;  %v1245_v8 = vpack.c.bf16 %v62_v5, %v60_v3  ;;  %v172_v10 = vld [vmem:[#allocation6] sm:$0xff]  ;;  %v174_v11 = vld [vmem:[#allocation6 + $0x10] sm:$0xff]  ;;  %v79_v51 = vshrl.u32 %v78_v50, 7  ;;  %vm402_vm4 = vcmask 519426   ;;  %vm622_vm5 = vcmask 261126  }
  0x2a   :  { %v1642_v9 = vpack.c.bf16 %v175_v7, %v173_v6  ;;  %v65_v12 = vld [vmem:[#allocation3 + $0x28] sm:$0xff]  ;;  %1244 = vmatprep.subr.bf16.mxu0 %v1243_v4  ;;  %v1644_v13 = vpack.c.bf16 %v174_v11, %v172_v10  ;;  %v67_v14 = vld [vmem:[#allocation3 + $0x38] sm:$0xff]  ;;  %v64_v15 = vld [vmem:[#allocation3 + $0x20] sm:$0xff]  ;;  %vm624_vm6 = vcmask 523526   ;;  %vm511_vm7 = vcmask 259076   ;;  %s1565_s1 = smov 32  }
  0x2b   :  { %v66_v16 = vld [vmem:[#allocation3 + $0x30] sm:$0xff]  ;;  %1246 = vmatpush1.bf16.msra.mxu0 %v1245_v8  ;;  %v1247_v17 = vpack.c.bf16 %v67_v14, %v65_v12  ;;  %v177_v19 = vld [vmem:[#allocation6 + $0x28] sm:$0xff]  ;;  %v179_v20 = vld [vmem:[#allocation6 + $0x38] sm:$0xff]  ;;  %v80_v52 = vsub.s32 0, %v79_v51  ;;  %v84_v1 = vsub.s32 1, %v79_v51  ;;  %vm513_vm8 = vcmask 521476  }
  0x2c   :  { %1260 = vmatprep.subr.bf16.mxu1 %v1642_v9  ;;  %v1249_v18 = vpack.c.bf16 %v66_v16, %v64_v15  ;;  %v176_v21 = vld [vmem:[#allocation6 + $0x20] sm:$0xff]  ;;  %v1648_v22 = vpack.c.bf16 %v179_v20, %v177_v19  ;;  %v178_v23 = vld [vmem:[#allocation6 + $0x30] sm:$0xff]  ;;  %v69_v24 = vld [vmem:[#allocation3 + $0x48] sm:$0xff] }
  0x2d   :  { %1262 = vmatpush1.bf16.msra.mxu1 %v1644_v13  ;;  %v71_v25 = vld [vmem:[#allocation3 + $0x58] sm:$0xff]  ;;  %1248 = vmatprep.subr.bf16.mxu0 %v1247_v17  ;;  %v1650_v26 = vpack.c.bf16 %v178_v23, %v176_v21  ;;  %v68_v28 = vld [vmem:[#allocation3 + $0x40] sm:$0xff]  ;;  %v70_v29 = vld [vmem:[#allocation3 + $0x50] sm:$0xff] }
  0x2e   :  { %v1251_v27 = vpack.c.bf16 %v71_v25, %v69_v24  ;;  %v181_v30 = vld [vmem:[#allocation6 + $0x48] sm:$0xff]  ;;  %1264 = vmatprep.subr.bf16.mxu1 %v1648_v22  ;;  %v183_v31 = vld [vmem:[#allocation6 + $0x58] sm:$0xff]  ;;  %v180_v32 = vld [vmem:[#allocation6 + $0x40] sm:$0xff]  ;;  %v1253_v34 = vpack.c.bf16 %v70_v29, %v68_v28 }
  0x2f   :  { %v182_v33 = vld [vmem:[#allocation6 + $0x50] sm:$0xff]  ;;  %1250 = vmatpush1.bf16.msra.mxu0 %v1249_v18  ;;  %v1653_v35 = vpack.c.bf16 %v183_v31, %v181_v30  ;;  %v73_v36 = vld [vmem:[#allocation3 + $0x68] sm:$0xff]  ;;  %v75_v37 = vld [vmem:[#allocation3 + $0x78] sm:$0xff] }
  0x30   :  { %v72_v38 = vld [vmem:[#allocation3 + $0x60] sm:$0xff]  ;;  %1252 = vmatprep.subr.bf16.mxu0 %v1251_v27  ;;  %v1656_v39 = vpack.c.bf16 %v182_v33, %v180_v32  ;;  %v1255_v40 = vpack.c.bf16 %v75_v37, %v73_v36  ;;  %v74_v41 = vld [vmem:[#allocation3 + $0x70] sm:$0xff]  ;;  %v185_v42 = vld [vmem:[#allocation6 + $0x68] sm:$0xff] }
  0x31   :  { %1266 = vmatpush1.bf16.msra.mxu1 %v1650_v26  ;;  %v187_v43 = vld [vmem:[#allocation6 + $0x78] sm:$0xff]  ;;  %v184_v45 = vld [vmem:[#allocation6 + $0x60] sm:$0xff]  ;;  %v186_v46 = vld [vmem:[#allocation6 + $0x70] sm:$0xff]  ;;  %v1257_v47 = vpack.c.bf16 %v74_v41, %v72_v38 }
  0x32   :  { %1268 = vmatprep.subr.bf16.mxu1 %v1653_v35  ;;  %v1659_v44 = vpack.c.bf16 %v187_v43, %v185_v42  ;;  %v1662_v48 = vpack.c.bf16 %v186_v46, %v184_v45  ;;  %v58_v49 = vld [vmem:[%s1919_s0] sm:$0xff]  ;;  %v59_v10 = vld [vmem:[%s1919_s0 + $0x8] sm:$0xff] }
  0x33   :  { %1254 = vmatpush1.bf16.msra.mxu0 %v1253_v34  ;;  %v76_v53 = vld [vmem:[%s1921_s2] sm:$0x3] }
  0x34   :  { %1256 = vmatprep.subr.bf16.mxu0 %v1255_v40  ;;  %v1694_v54 = vrot.slane %v76_v53, %v80_v52  ;;  %v1703_v2 = vld [vmem:[%s1923_s4] ss:$0 sm:$0xff]  ;;  %v1705_v3 = vrot.slane %v76_v53, %v84_v1  ;;  %s1564_s4 = smov 64  }
  0x35   :  { %1270 = vmatpush1.bf16.msra.mxu1 %v1656_v39 }
  0x36   :  { %1272 = vmatprep.subr.bf16.mxu1 %v1659_v44 }
  0x37   :  { %1258 = vmatpush1.bf16.msra.mxu0 %v1257_v47 }
  0x38   :  { %1276 = vmatprep.subr.bf16.mxu0 %v1642_v9 }
  0x39   :  { %1274 = vmatpush1.bf16.msra.mxu1 %v1662_v48 }
  0x3a   :  { %1292 = vmatprep.subr.bf16.mxu1 %v1642_v9  ;;  %1193 = vmatmul.mubr.msk.f32.vlgmr.msra.gmra.mrb[0].mxu0 %vm88_vm0, %v58_v49 }
  0x3b   :  { %1278 = vmatpush1.bf16.msra.mxu0 %v1644_v13  ;;  %165 = vmatprep.mubr.f32.mxu0 %v1563_v0 }
  0x3c   :  { %263 = vmatmul.mubr.f32.vlgmr.msra.gmra.mrb[0].mxu1 %v1563_v0  ;;  %1280 = vmatprep.subr.bf16.mxu0 %v1648_v22 }
  0x3d   :  { %1294 = vmatpush1.bf16.msra.mxu1 %v1644_v13  ;;  %473 = vmatprep.mubr.f32.mxu1 %v1563_v0 }
  0x3e   :  { %1296 = vmatprep.subr.bf16.mxu1 %v1648_v22  ;;  %1194 = vmatmul.mubr.msk.f32.gmra.mrb[2].mxu0 %vm88_vm0, %v59_v10 }
  0x3f   :  { %1282 = vmatpush1.bf16.msra.mxu0 %v1650_v26  ;;  %362 = vmatprep.mubr.f32.mxu0 %v1563_v0 }
  0x40   :  { %1284 = vmatprep.subr.bf16.mxu0 %v1653_v35 }
  0x41   :  { %1298 = vmatpush1.bf16.msra.mxu1 %v1650_v26 }
  0x42   :  { %1300 = vmatprep.subr.bf16.mxu1 %v1653_v35 }
  0x43   :  { %1286 = vmatpush1.bf16.msra.mxu0 %v1656_v39 }
  0x44   :  { %1288 = vmatprep.subr.bf16.mxu0 %v1659_v44 }
  0x45   :  { %1302 = vmatpush1.bf16.msra.mxu1 %v1656_v39 }
  0x46   :  { %1304 = vmatprep.subr.bf16.mxu1 %v1659_v44 }
  0x47   :  { %1290 = vmatpush1.bf16.msra.mxu0 %v1662_v48 }
  0x48   :  { %1308 = vmatprep.subr.bf16.mxu0 %v1642_v9 }
  0x49   :  { %1306 = vmatpush1.bf16.msra.mxu1 %v1662_v48 }
  0x4a   :  { %1324 = vmatprep.subr.bf16.mxu1 %v1642_v9 }
 0x10d   :  { %v161_v55 = vpop.f32.mrb[0].mxu0 }
 0x10e   :  { %v1697_v56 = vadd.f32 %v161_v55, %v1694_v54  ;;  %v163_v57 = vpop.f32.mrb[1].mxu0 }
 0x10f   :  { %v264_v58 = vpop.f32.mrb[0].mxu1  ;;  %v1709_v6 = vadd.f32 %v163_v57, %v1705_v3 }
 0x110   :  { %v266_v59 = vpop.f32.mrb[1].mxu1  ;;  %v269_v60 = vadd.f32 %v264_v58, %v1697_v56 }
 0x111   :  { %v276_v4 = vadd.f32 %v1703_v2, %v266_v59  ;;  %v1719_v18 = vpop.f32.mrb[2].mxu0 }
 0x112   :  { %v1196_v61 = vmul.f32 -1.442695, %v269_v60  ;;  %v1721_v19 = vpop.f32.mrb[3].mxu0 }
 0x114   :  { %1415 = vpow2.f32 %v1196_v61 }
 0x11e   :  { %v1416_v62 = vpop.eup %1415 }
 0x11f   :  { %v273_v63 = vadd.f32 1.0, %v1416_v62 }
 0x121   :  { %1417 = vrcp.f32 %v273_v63 }
 0x12b   :  { %v1418_v5 = vpop.eup %1417 }
 0x12c   :  { %v277_v7 = vmul.f32 %v1418_v5, %v276_v4  ;;  %v280_v12 = vsub.f32 1.0, %v1418_v5  ;;  %v286_v15 = vmul.f32 0.0, %v1418_v5 }
 0x12e   :  { %v278_v8 = vadd.f32 %v277_v7, %v1709_v6 }
 0x130   :  { %1419 = vtanh.f32 %v278_v8 }
 0x13a   :  { %v1420_v11 = vpop.eup %1419 }
 0x13b   :  { %282 = vrot.lane.b32.xlu0 %v1420_v11, %s1564_s4 }
 0x1ad   :  { %v283_v14 = vpop.permute.xlu0 %282 }
 0x1ae   :  { %v285_v16 = vmul.f32 %v283_v14, %v280_v12 }
 0x1b0   :  { %v287_v17 = vadd.f32 %v286_v15, %v285_v16 }
 0x1b2   :  { %289 = vrot.lane.b32.xlu0 %v287_v17, %s1564_s4  ;;  %v392_v31 = vrot.slane %v287_v17, 6 }
 0x224   :  { %v290_v20 = vpop.permute.xlu0 %289 }
 0x225   :  { %293 = vst.msk [vmem:[#allocation2] sm:$0x3] %vm292_vm1, %v290_v20  ;;  %1197 = vmatmul.mubr.msk.f32.vlgmr.msra.gmra.mrb[4].mxu0 %vm88_vm0, %v290_v20 }
 0x226   :  { %295 = vst.msk [vmem:[#allocation2 + $0xe] sm:$0x3] %vm294_vm2, %v290_v20  ;;  %1310 = vmatpush1.bf16.msra.mxu0 %v1644_v13  ;;  %584 = vmatprep.mubr.f32.mxu0 %v1563_v0 }
 0x227   :  { %1312 = vmatprep.subr.bf16.mxu0 %v1648_v22 }
 0x22a   :  { %1314 = vmatpush1.bf16.msra.mxu0 %v1650_v26 }
 0x22b   :  { %1316 = vmatprep.subr.bf16.mxu0 %v1653_v35 }
 0x22e   :  { %1318 = vmatpush1.bf16.msra.mxu0 %v1656_v39 }
 0x22f   :  { %1320 = vmatprep.subr.bf16.mxu0 %v1659_v44 }
 0x232   :  { %1322 = vmatpush1.bf16.msra.mxu0 %v1662_v48 }
 0x233   :  { %1340 = vmatprep.subr.bf16.mxu0 %v1642_v9 }
 0x2f8   :  { %v364_v21 = vpop.f32.mrb[4].mxu0 }
 0x2f9   :  { %v370_v23 = vrot.slane %v364_v21, 6  ;;  %v366_v24 = vpop.f32.mrb[5].mxu0 }
 0x2fa   :  { %v379_v30 = vadd.f32 %v1703_v2, %v366_v24 }
 0x2fb   :  { %v372_v25 = vadd.f32 %v370_v23, %v1697_v56 }
 0x2fc   :  { %v381_v32 = vrot.slane %v379_v30, 6 }
 0x2fd   :  { %v1198_v27 = vmul.f32 -1.442695, %v372_v25 }
 0x2ff   :  { %1421 = vpow2.f32 %v1198_v27 }
 0x309   :  { %v1422_v28 = vpop.eup %1421 }
 0x30a   :  { %v376_v29 = vadd.f32 1.0, %v1422_v28 }
 0x30c   :  { %1423 = vrcp.f32 %v376_v29 }
 0x316   :  { %v1424_v33 = vpop.eup %1423 }
 0x317   :  { %v383_v34 = vmul.f32 %v1424_v33, %v381_v32  ;;  %v394_v36 = vmul.f32 %v1424_v33, %v392_v31  ;;  %v386_v40 = vsub.f32 1.0, %v1424_v33 }
 0x319   :  { %v384_v37 = vadd.f32 %v383_v34, %v1709_v6 }
 0x31b   :  { %1425 = vtanh.f32 %v384_v37 }
 0x325   :  { %v1426_v38 = vpop.eup %1425 }
 0x326   :  { %388 = vrot.lane.b32.xlu1 %v1426_v38, %s1564_s4 }
 0x398   :  { %v389_v41 = vpop.permute.xlu1 %388 }
 0x399   :  { %v391_v42 = vmul.f32 %v389_v41, %v386_v40 }
 0x39b   :  { %v1739_v43 = vadd.f32 %v394_v36, %v391_v42 }
 0x39d   :  { %v404_v45 = vrot.slane %v1739_v43, 2  ;;  %v503_v1 = vrot.slane %v1739_v43, 6 }
 0x39f   :  { %405 = vrot.lane.b32.xlu1 %v404_v45, %s1564_s4 }
 0x411   :  { %v406_v46 = vpop.permute.xlu1 %405 }
 0x412   :  { %1199 = vmatmul.mubr.msk.f32.vlgmr.msra.gmra.mrb[2].mxu1 %vm88_vm0, %v406_v46 }
 0x413   :  { %1326 = vmatpush1.bf16.msra.mxu1 %v1644_v13  ;;  %695 = vmatprep.mubr.f32.mxu1 %v1563_v0 }
 0x414   :  { %1328 = vmatprep.subr.bf16.mxu1 %v1648_v22 }
 0x417   :  { %1330 = vmatpush1.bf16.msra.mxu1 %v1650_v26 }
 0x418   :  { %1332 = vmatprep.subr.bf16.mxu1 %v1653_v35 }
 0x41b   :  { %1334 = vmatpush1.bf16.msra.mxu1 %v1656_v39 }
 0x41c   :  { %1336 = vmatprep.subr.bf16.mxu1 %v1659_v44 }
 0x41f   :  { %1338 = vmatpush1.bf16.msra.mxu1 %v1662_v48 }
 0x420   :  { %1356 = vmatprep.subr.bf16.mxu1 %v1642_v9 }
 0x4e5   :  { %v475_v47 = vpop.f32.mrb[2].mxu1 }
 0x4e6   :  { %v481_v49 = vrot.slane %v475_v47, 4  ;;  %v477_v50 = vpop.f32.mrb[3].mxu1 }
 0x4e7   :  { %v490_v57 = vadd.f32 %v1703_v2, %v477_v50 }
 0x4e8   :  { %v483_v51 = vadd.f32 %v481_v49, %v1697_v56  ;;  %v1798_v49 = vadd.f32 %v1721_v19, %v1705_v3 }
 0x4e9   :  { %v492_v58 = vrot.slane %v490_v57, 4 }
 0x4ea   :  { %v1200_v52 = vmul.f32 -1.442695, %v483_v51 }
 0x4ec   :  { %1427 = vpow2.f32 %v1200_v52 }
 0x4f6   :  { %v1428_v53 = vpop.eup %1427 }
 0x4f7   :  { %v487_v55 = vadd.f32 1.0, %v1428_v53 }
 0x4f9   :  { %1429 = vrcp.f32 %v487_v55 }
 0x503   :  { %v1430_v59 = vpop.eup %1429 }
 0x504   :  { %v494_v60 = vmul.f32 %v1430_v59, %v492_v58  ;;  %v497_v63 = vsub.f32 1.0, %v1430_v59  ;;  %v505_v5 = vmul.f32 %v1430_v59, %v503_v1 }
 0x506   :  { %v495_v61 = vadd.f32 %v494_v60, %v1709_v6 }
 0x508   :  { %1431 = vtanh.f32 %v495_v61 }
 0x512   :  { %v1432_v62 = vpop.eup %1431 }
 0x513   :  { %499 = vrot.lane.b32.xlu0 %v1432_v62, %s1564_s4 }
 0x585   :  { %v500_v4 = vpop.permute.xlu0 %499 }
 0x586   :  { %v502_v7 = vmul.f32 %v500_v4, %v497_v63 }
 0x588   :  { %v1758_v8 = vadd.f32 %v505_v5, %v502_v7 }
 0x58a   :  { %v515_v10 = vrot.slane %v1758_v8, 4  ;;  %v614_v30 = vrot.slane %v1758_v8, 6 }
 0x58c   :  { %516 = vrot.lane.b32.xlu1 %v515_v10, %s1564_s4 }
 0x5fe   :  { %v517_v11 = vpop.permute.xlu1 %516 }
 0x5ff   :  { %1201 = vmatmul.mubr.msk.f32.vlgmr.msra.gmra.mrb[6].mxu0 %vm88_vm0, %v517_v11 }
 0x600   :  { %1342 = vmatpush1.bf16.msra.mxu0 %v1644_v13  ;;  %794 = vmatprep.mubr.f32.mxu0 %v1563_v0 }
 0x601   :  { %1344 = vmatprep.subr.bf16.mxu0 %v1648_v22 }
 0x604   :  { %1346 = vmatpush1.bf16.msra.mxu0 %v1650_v26 }
 0x605   :  { %1348 = vmatprep.subr.bf16.mxu0 %v1653_v35 }
 0x608   :  { %1350 = vmatpush1.bf16.msra.mxu0 %v1656_v39 }
 0x609   :  { %1352 = vmatprep.subr.bf16.mxu0 %v1659_v44 }
 0x60c   :  { %1354 = vmatpush1.bf16.msra.mxu0 %v1662_v48 }
 0x60d   :  { %1372 = vmatprep.subr.bf16.mxu0 %v1642_v9 }
 0x6d2   :  { %v586_v12 = vpop.f32.mrb[6].mxu0 }
 0x6d3   :  { %v592_v14 = vrot.slane %v586_v12, 2  ;;  %v588_v15 = vpop.f32.mrb[7].mxu0 }
 0x6d4   :  { %v601_v23 = vadd.f32 %v1703_v2, %v588_v15 }
 0x6d5   :  { %v594_v16 = vadd.f32 %v592_v14, %v1697_v56 }
 0x6d6   :  { %v603_v24 = vrot.slane %v601_v23, 2 }
 0x6d7   :  { %v1202_v17 = vmul.f32 -1.442695, %v594_v16 }
 0x6d9   :  { %1433 = vpow2.f32 %v1202_v17 }
 0x6e3   :  { %v1434_v20 = vpop.eup %1433 }
 0x6e4   :  { %v598_v21 = vadd.f32 1.0, %v1434_v20 }
 0x6e6   :  { %1435 = vrcp.f32 %v598_v21 }
 0x6f0   :  { %v1436_v25 = vpop.eup %1435 }
 0x6f1   :  { %v605_v27 = vmul.f32 %v1436_v25, %v603_v24  ;;  %v608_v9 = vsub.f32 1.0, %v1436_v25  ;;  %v616_v31 = vmul.f32 %v1436_v25, %v614_v30 }
 0x6f3   :  { %v606_v28 = vadd.f32 %v605_v27, %v1709_v6  ;;  %v1792_v6 = vadd.f32 %v1719_v18, %v1694_v54 }
 0x6f5   :  { %1437 = vtanh.f32 %v606_v28 }
 0x6ff   :  { %v1438_v29 = vpop.eup %1437 }
 0x700   :  { %610 = vrot.lane.b32.xlu0 %v1438_v29, %s1564_s4 }
 0x772   :  { %v611_v56 = vpop.permute.xlu0 %610 }
 0x773   :  { %v613_v32 = vmul.f32 %v611_v56, %v608_v9 }
 0x775   :  { %v1777_v33 = vadd.f32 %v616_v31, %v613_v32 }
 0x777   :  { %v626_v34 = vrot.slane %v1777_v33, 6 }
 0x779   :  { %627 = vrot.lane.b32.xlu1 %v626_v34, %s1564_s4 }
 0x7eb   :  { %v628_v36 = vpop.permute.xlu1 %627 }
 0x7ec   :  { %1203 = vmatmul.mubr.msk.f32.vlgmr.msra.gmra.mrb[4].mxu1 %vm88_vm0, %v628_v36 }
 0x7ed   :  { %1358 = vmatpush1.bf16.msra.mxu1 %v1644_v13  ;;  %903 = vmatprep.mubr.f32.mxu1 %v1563_v0 }
 0x7ee   :  { %1360 = vmatprep.subr.bf16.mxu1 %v1648_v22 }
 0x7f1   :  { %1362 = vmatpush1.bf16.msra.mxu1 %v1650_v26 }
 0x7f2   :  { %1364 = vmatprep.subr.bf16.mxu1 %v1653_v35 }
 0x7f5   :  { %1366 = vmatpush1.bf16.msra.mxu1 %v1656_v39 }
 0x7f6   :  { %1368 = vmatprep.subr.bf16.mxu1 %v1659_v44 }
 0x7f9   :  { %1370 = vmatpush1.bf16.msra.mxu1 %v1662_v48 }
 0x8bf   :  { %v697_v37 = vpop.f32.mrb[4].mxu1 }
 0x8c0   :  { %v702_v38 = vadd.f32 %v697_v37, %v1792_v6  ;;  %v699_v40 = vpop.f32.mrb[5].mxu1 }
 0x8c1   :  { %v709_v46 = vadd.f32 %v1703_v2, %v699_v40 }
 0x8c2   :  { %v1204_v41 = vmul.f32 -1.442695, %v702_v38 }
 0x8c4   :  { %1439 = vpow2.f32 %v1204_v41 }
 0x8ce   :  { %v1440_v42 = vpop.eup %1439 }
 0x8cf   :  { %v706_v45 = vadd.f32 1.0, %v1440_v42 }
 0x8d1   :  { %1441 = vrcp.f32 %v706_v45 }
 0x8db   :  { %v1442_v47 = vpop.eup %1441 }
 0x8dc   :  { %v710_v50 = vmul.f32 %v1442_v47, %v709_v46  ;;  %v713_v51 = vsub.f32 1.0, %v1442_v47  ;;  %v720_v53 = vmul.f32 %v1442_v47, %v626_v34 }
 0x8de   :  { %v711_v54 = vadd.f32 %v710_v50, %v1798_v49 }
 0x8e0   :  { %1443 = vtanh.f32 %v711_v54 }
 0x8ea   :  { %v1444_v18 = vpop.eup %1443 }
 0x8eb   :  { %715 = vrot.lane.b32.xlu0 %v1444_v18, %s1564_s4 }
 0x95d   :  { %v716_v52 = vpop.permute.xlu0 %715 }
 0x95e   :  { %v718_v55 = vmul.f32 %v716_v52, %v713_v51 }
 0x960   :  { %v721_v57 = vadd.f32 %v720_v53, %v718_v55 }
 0x962   :  { %723 = vrot.lane.b32.xlu1 %v721_v57, %s1564_s4 }
 0x9d4   :  { %v1803_v58 = vpop.permute.xlu1 %723 }
 0x9d5   :  { %1205 = vmatmul.mubr.msk.f32.vlgmr.msra.gmra.mrb[8].mxu0 %vm88_vm0, %v1803_v58 }
 0x9d6   :  { %1374 = vmatpush1.bf16.msra.mxu0 %v1644_v13  ;;  %1012 = vmatprep.mubr.f32.mxu0 %v1563_v0 }
 0x9d7   :  { %1376 = vmatprep.subr.bf16.mxu0 %v1648_v22 }
 0x9da   :  { %1378 = vmatpush1.bf16.msra.mxu0 %v1650_v26  ;;  %v824_v26 = vrot.slane %v721_v57, 6 }
 0x9db   :  { %1380 = vmatprep.subr.bf16.mxu0 %v1653_v35 }
 0x9de   :  { %1382 = vmatpush1.bf16.msra.mxu0 %v1656_v39 }
 0x9df   :  { %1384 = vmatprep.subr.bf16.mxu0 %v1659_v44 }
 0x9e2   :  { %1386 = vmatpush1.bf16.msra.mxu0 %v1662_v48 }
 0xaa8   :  { %v796_v3 = vpop.f32.mrb[8].mxu0 }
 0xaa9   :  { %v802_v19 = vrot.slane %v796_v3, 6  ;;  %v798_v59 = vpop.f32.mrb[9].mxu0 }
 0xaaa   :  { %v811_v22 = vadd.f32 %v1703_v2, %v798_v59 }
 0xaab   :  { %v804_v60 = vadd.f32 %v802_v19, %v1792_v6  ;;  %v1063_v19 = vld [vmem:[%s1924_s5 + $0x18] sm:$0xff] }
 0xaac   :  { %v813_v35 = vrot.slane %v811_v22, 6 }
 0xaad   :  { %v1206_v13 = vmul.f32 -1.442695, %v804_v60  ;;  %v1064_v60 = vld [vmem:[%s1924_s5 + $0x20] sm:$0xff] }
 0xaaf   :  { %1445 = vpow2.f32 %v1206_v13  ;;  %v1065_v13 = vld [vmem:[%s1924_s5 + $0x28] sm:$0xff] }
 0xab9   :  { %v1446_v0 = vpop.eup %1445 }
 0xaba   :  { %v808_v61 = vadd.f32 1.0, %v1446_v0  ;;  %v1395_v0 = vpack.c.bf16 %v1065_v13, %v1064_v60 }
 0xabc   :  { %1447 = vrcp.f32 %v808_v61  ;;  %v1066_v61 = vld [vmem:[%s1924_s5 + $0x30] sm:$0xff] }
 0xac6   :  { %v1448_v62 = vpop.eup %1447 }
 0xac7   :  { %v815_v39 = vmul.f32 %v1448_v62, %v813_v35  ;;  %v826_v63 = vmul.f32 %v1448_v62, %v824_v26  ;;  %v818_v1 = vsub.f32 1.0, %v1448_v62 }
 0xac9   :  { %v816_v44 = vadd.f32 %v815_v39, %v1798_v49 }
 0xacb   :  { %1449 = vtanh.f32 %v816_v44 }
 0xad5   :  { %v1450_v48 = vpop.eup %1449 }
 0xad6   :  { %820 = vrot.lane.b32.xlu0 %v1450_v48, %s1564_s4 }
 0xb48   :  { %v821_v4 = vpop.permute.xlu0 %820 }
 0xb49   :  { %v823_v5 = vmul.f32 %v821_v4, %v818_v1 }
 0xb4b   :  { %v1819_v7 = vadd.f32 %v826_v63, %v823_v5 }
 0xb4d   :  { %v834_v10 = vrot.slane %v1819_v7, 2  ;;  %v933_v30 = vrot.slane %v1819_v7, 6 }
 0xb4f   :  { %835 = vrot.lane.b32.xlu1 %v834_v10, %s1564_s4 }
 0xbc1   :  { %v836_v11 = vpop.permute.xlu1 %835 }
 0xbc2   :  { %1207 = vmatmul.mubr.msk.f32.vlgmr.msra.gmra.mrb[6].mxu1 %vm88_vm0, %v836_v11 }
 0xc95   :  { %v905_v12 = vpop.f32.mrb[6].mxu1 }
 0xc96   :  { %v911_v14 = vrot.slane %v905_v12, 4  ;;  %v907_v15 = vpop.f32.mrb[7].mxu1 }
 0xc97   :  { %v920_v23 = vadd.f32 %v1703_v2, %v907_v15 }
 0xc98   :  { %v913_v16 = vadd.f32 %v911_v14, %v1792_v6 }
 0xc99   :  { %v922_v24 = vrot.slane %v920_v23, 4 }
 0xc9a   :  { %v1208_v17 = vmul.f32 -1.442695, %v913_v16 }
 0xc9c   :  { %1451 = vpow2.f32 %v1208_v17 }
 0xca6   :  { %v1452_v20 = vpop.eup %1451 }
 0xca7   :  { %v917_v21 = vadd.f32 1.0, %v1452_v20 }
 0xca9   :  { %1453 = vrcp.f32 %v917_v21 }
 0xcb3   :  { %v1454_v25 = vpop.eup %1453 }
 0xcb4   :  { %v924_v27 = vmul.f32 %v1454_v25, %v922_v24  ;;  %v927_v9 = vsub.f32 1.0, %v1454_v25  ;;  %v935_v31 = vmul.f32 %v1454_v25, %v933_v30 }
 0xcb6   :  { %v925_v28 = vadd.f32 %v924_v27, %v1798_v49 }
 0xcb8   :  { %1455 = vtanh.f32 %v925_v28 }
 0xcc2   :  { %v1456_v29 = vpop.eup %1455 }
 0xcc3   :  { %929 = vrot.lane.b32.xlu0 %v1456_v29, %s1564_s4 }
 0xd35   :  { %v930_v56 = vpop.permute.xlu0 %929 }
 0xd36   :  { %v932_v32 = vmul.f32 %v930_v56, %v927_v9 }
 0xd38   :  { %v936_v34 = vadd.f32 %v935_v31, %v932_v32 }
 0xd3a   :  { %v943_v36 = vrot.slane %v936_v34, 4  ;;  %v1042_v51 = vrot.slane %v936_v34, 6 }
 0xd3c   :  { %944 = vrot.lane.b32.xlu1 %v943_v36, %s1564_s4 }
 0xd40   :  { %397 = vrot.lane.b32.xlu1 %v1739_v43, %s1564_s4 }
 0xd44   :  { %619 = vrot.lane.b32.xlu1 %v1777_v33, %s1564_s4 }
 0xd48   :  { %938 = vrot.lane.b32.xlu1 %v936_v34, %s1564_s4 }
 0xdae   :  { %v945_v37 = vpop.permute.xlu1 %944 }
 0xdaf   :  { %1209 = vmatmul.mubr.msk.f32.vlgmr.msra.gmra.mrb[10].mxu0 %vm88_vm0, %v945_v37 }
 0xdb2   :  { %v398_v38 = vpop.permute.xlu1 %397 }
 0xdb3   :  { %401 = vst.msk [vmem:[#allocation2] sm:$0xc] %vm400_vm3, %v398_v38 }
 0xdb4   :  { %403 = vst.msk [vmem:[#allocation2 + $0xa] sm:$0xc] %vm402_vm4, %v398_v38 }
 0xdb6   :  { %v620_v40 = vpop.permute.xlu1 %619 }
 0xdb7   :  { %623 = vst.msk [vmem:[#allocation2] sm:$0xc0] %vm622_vm5, %v620_v40 }
 0xdb8   :  { %625 = vst.msk [vmem:[#allocation2 + $0x2] sm:$0xc0] %vm624_vm6, %v620_v40 }
 0xdb9   :  { %726 = vst.msk [vmem:[#allocation2 + $0x8] sm:$0x3] %vm292_vm1, %v1803_v58 }
 0xdba   :  { %727 = vst.msk [vmem:[#allocation2 + $0x6] sm:$0x3] %vm294_vm2, %v1803_v58  ;;  %v939_v43 = vpop.permute.xlu1 %938  ;;  %v1060_v58 = vld [vmem:[%s1924_s5] sm:$0xff] }
 0xdbb   :  { %941 = vst.msk [vmem:[#allocation2 + $0x8] sm:$0x30] %vm511_vm7, %v939_v43 }
 0xdbc   :  { %942 = vst.msk [vmem:[#allocation2 - $0x2] sm:$0x30] %vm513_vm8, %v939_v43 }
 0xe82   :  { %v1014_v33 = vpop.f32.mrb[10].mxu0 }
 0xe83   :  { %v1020_v41 = vrot.slane %v1014_v33, 2  ;;  %v1016_v42 = vpop.f32.mrb[11].mxu0 }
 0xe84   :  { %v1029_v54 = vadd.f32 %v1703_v2, %v1016_v42  ;;  %v1062_v2 = vld [vmem:[%s1924_s5 + $0x10] sm:$0xff] }
 0xe85   :  { %v1022_v45 = vadd.f32 %v1020_v41, %v1792_v6  ;;  %v1061_v6 = vld [vmem:[%s1924_s5 + $0x8] sm:$0xff]  ;;  %v1391_v59 = vpack.c.bf16 %v1063_v19, %v1062_v2 }
 0xe86   :  { %v1031_v18 = vrot.slane %v1029_v54, 2  ;;  %v1387_v3 = vpack.c.bf16 %v1061_v6, %v1060_v58 }
 0xe87   :  { %v1210_v46 = vmul.f32 -1.442695, %v1022_v45 }
 0xe88   :  { %1388 = vmatprep.subr.bf16.mxu1 %v1387_v3 }
 0xe89   :  { %1457 = vpow2.f32 %v1210_v46  ;;  %1390 = vmatpush3.bf16.msra.mxu1 %v1387_v3 }
 0xe8a   :  { %1392 = vmatprep.subr.bf16.mxu1 %v1391_v59 }
 0xe8d   :  { %1394 = vmatpush3.bf16.msra.mxu1 %v1391_v59 }
 0xe8e   :  { %1396 = vmatprep.subr.bf16.mxu1 %v1395_v0 }
 0xe91   :  { %1398 = vmatpush3.bf16.msra.mxu1 %v1395_v0 }
 0xe93   :  { %v1458_v47 = vpop.eup %1457 }
 0xe94   :  { %v1026_v50 = vadd.f32 1.0, %v1458_v47 }
 0xe96   :  { %1459 = vrcp.f32 %v1026_v50 }
 0xea0   :  { %v1460_v52 = vpop.eup %1459 }
 0xea1   :  { %v1033_v53 = vmul.f32 %v1460_v52, %v1031_v18  ;;  %v1044_v55 = vmul.f32 %v1460_v52, %v1042_v51  ;;  %v1036_v26 = vsub.f32 1.0, %v1460_v52 }
 0xea3   :  { %v1034_v57 = vadd.f32 %v1033_v53, %v1798_v49 }
 0xea5   :  { %1461 = vtanh.f32 %v1034_v57 }
 0xeaf   :  { %v1462_v49 = vpop.eup %1461 }
 0xeb0   :  { %1038 = vrot.lane.b32.xlu0 %v1462_v49, %s1564_s4 }
 0xeb4   :  { %508 = vrot.lane.b32.xlu0 %v1758_v8, %s1564_s4  ;;  %v1067_v8 = vld [vmem:[%s1924_s5 + $0x38] sm:$0xff]  ;;  %s1566_s5 = smov [#allocation9]  }
 0xeb5   :  { %v1399_v22 = vpack.c.bf16 %v1067_v8, %v1066_v61  ;;  %s1176_s28 = sshll.u32 %s1566_s5, 4  ;;  %s1177_s28 = int_to_ptr.vmem [resolvable:$true] %s1176_s28 }
 0xeb6   :  { %s1507_s3 = scalar_lea.vmem %s1177_s28, 64  ;;  %p1512_p3 = scmp.lt.s32.totalorder %s1177_s28, %s1177_s28 }
 0xeb7   :  { %1400 = vmatprep.subr.bf16.mxu1 %v1399_v22  ;;  %p1508_p2 = scmp.ne.s32.totalorder %s1177_s28, %s1507_s3  ;;  %p1513_p4 = scmp.lt.s32.totalorder %s1507_s3, %s1507_s3 }
 0xeb8   :  { %829 = vrot.lane.b32.xlu0 %v1819_v7, %s1564_s4  ;;  %1402 = vmatpush3.bf16.msra.mxu1 %v1399_v22 }
 0xeb9   :  { %p1514_p5 = por %p1513_p4, %p1512_p3 }
 0xebb   :  { %p1515_p6 = pnand %p1514_p5, %p1508_p2 }
 0xf22   :  { %v1039_v35 = vpop.permute.xlu0 %1038 }
 0xf23   :  { %v1041_v62 = vmul.f32 %v1039_v35, %v1036_v26 }
 0xf25   :  { %v1045_v39 = vadd.f32 %v1044_v55, %v1041_v62 }
 0xf26   :  { %v509_v63 = vpop.permute.xlu0 %508 }
 0xf27   :  { %512 = vst.msk [vmem:[#allocation2] sm:$0x30] %vm511_vm7, %v509_v63  ;;  %1053 = vrot.lane.b32.xlu1 %v1045_v39, %s1565_s1  ;;  %1047 = vrot.lane.b32.xlu0 %v1045_v39, %s1564_s4 }
 0xf28   :  { %514 = vst.msk [vmem:[#allocation2 + $0x6] sm:$0x30] %vm513_vm8, %v509_v63 }
 0xf2a   :  { %v830_v44 = vpop.permute.xlu0 %829 }
 0xf2b   :  { %832 = vst.msk [vmem:[#allocation2 + $0x8] sm:$0xc] %vm400_vm3, %v830_v44 }
 0xf2c   :  { %833 = vst.msk [vmem:[#allocation2 + $0x2] sm:$0xc] %vm402_vm4, %v830_v44 }
 0xf99   :  { %v1048_v48 = vpop.permute.xlu0 %1047  ;;  %v1054_v1 = vpop.permute.xlu1 %1053 }
 0xf9a   :  { %1050 = vst.msk [vmem:[#allocation2 + $0x8] sm:$0xc0] %vm622_vm5, %v1048_v48  ;;  %1052 = vst.msk [vmem:[#allocation9 - $0x6] sm:$0xc0] %vm622_vm5, %v1048_v48 }
 0xf9b   :  { %1051 = vst.msk [vmem:[#allocation2 - $0x6] sm:$0xc0] %vm624_vm6, %v1048_v48 }
 0xf9c   :  { %1057 = vst.msk [vmem:[#allocation9 - $0x4] sm:$0xc0] %vm622_vm5, %v1054_v1 }
 0xfa1   :  { %v1059_v5 = vld [vmem:[#allocation2 + $0x8] sm:$0xff] }
 0xfa2   :  { %v1058_v4 = vld [vmem:[#allocation2] sm:$0xff] }
 0xfa3   :  { %1240 = vmatprep.mubr.msk.f32.mxu1 %vm88_vm0, %v1058_v4 }
 0xfa4   :  { %1241 = vmatmul.mubr.msk.f32.vlgmr.msra.gmra.mrb[8].mxu1 %vm88_vm0, %v1059_v5 }
 0xfa5   :  { %1518 = shalt.err (!%p1515_p6)
}
 0xfa6   :  { %s1519_s10 = scalar_lea.hbm %s1927_s8, 64 }
 0xfa7   :  { %p1520_p7 = scmp.ne.s32.totalorder %s1927_s8, %s1519_s10  ;;  %p1523_p8 = scmp.lt.u32.totalorder %s1519_s10, %s1927_s8 }
 0xfa9   :  { %p1525_p9 = pnand %p1523_p8, %p1520_p7 }
 0xfab   :  { %1528 = shalt.err (!%p1525_p9)
}
 0xfac   :  { %s1567_s4 = smov 2   ;;  %v1211_v7 = vld [vmem:[%s1925_s6] ss:$0 sm:$0xff]  ;;  %s1568_s17 = smov [#allocation8]   ;;  %vm1156_vm9 = vcmask 130048  }
 0xfad   :  { %1182 = dma.vmem_to_hbm [thread:$0]  %s1177_s28, 64, %s1927_s8, [#allocation10], %s1565_s1, %s1565_s1, %s1567_s4  }
 0xfae   :  { %s1164_s18 = sshll.u32 %s1568_s17, 4  ;;  %s1165_s18 = int_to_ptr.vmem [resolvable:$true] %s1164_s18 }
 0xfaf   :  { %s1529_s19 = scalar_lea.vmem %s1165_s18, 256  ;;  %p1534_p11 = scmp.lt.s32.totalorder %s1165_s18, %s1165_s18 }
 0xfb0   :  { %p1530_p10 = scmp.ne.s32.totalorder %s1165_s18, %s1529_s19  ;;  %p1535_p12 = scmp.lt.s32.totalorder %s1529_s19, %s1529_s19 }
 0xfb2   :  { %p1536_p13 = por %p1535_p12, %p1534_p11 }
 0xfb4   :  { %p1537_p0 = pnand %p1536_p13, %p1530_p10 }
0x1077   :  { %v1242_v10 = vpop.f32.mrb[8].mxu1 }
0x1078   :  { %v1153_v11 = vadd.f32 %v1242_v10, %v1211_v7  ;;  %v1147_v12 = vpop.f32.mrb[9].mxu1 }
0x1079   :  { %v1148_v14 = vadd.f32 %v1211_v7, %v1147_v12 }
0x107a   :  { %1158 = vst.msk [vmem:[#allocation8 + $0x8] sm:$0xff] %vm1156_vm9, %v1153_v11 }
0x107b   :  { %1157 = vst.msk [vmem:[#allocation8] sm:$0xff] %vm1156_vm9, %v1148_v14 }
0x107c   :  { %1540 = shalt.err (!%p1537_p0)
}
0x107d   :  { %s1541_s6 = scalar_lea.hbm %s1926_s7, 256 }
0x107e   :  { %p1542_p1 = scmp.ne.s32.totalorder %s1926_s7, %s1541_s6  ;;  %p1545_p2 = scmp.lt.u32.totalorder %s1541_s6, %s1926_s7 }
0x1080   :  { %p1547_p3 = pnand %p1545_p2, %p1542_p1 }
0x1082   :  { %1550 = shalt.err (!%p1547_p3)
}
0x1083   :  { %s1569_s25 = smov 128   ;;  %s1570_s26 = smov 8  }
0x1084   :  { %1170 = dma.vmem_to_hbm [thread:$0]  %s1165_s18, 256, %s1926_s7, [#allocation5], %s1569_s25, %s1569_s25, %s1570_s26  }
0x1085   :  { %1555 = dma.done.wait [#allocation5], 256  }
0x1086   :  { %1556 = vsyncadd [#allocation5], 4294967040 }
0x1087   :  { %1557 = dma.done.wait [#allocation10], 64  }
0x1088   :  { %1558 = vsyncadd [#allocation10], 4294967232 }
0x1089   :  { %1189 = vsyncpa [#allocation4], 1 }
0x108a   :  { %1190 = vsyncpa [#allocation7], 1 }
0x108b   :  { %1191 = vsyncpa [#allocation5], 1 }
0x108c   :  { %1192 = vsyncpa [#allocation10], 1 }

</bundles_post_ra>
